<compile_context>
chip_gen: v7x
topology: tpu7x:2x2x1
jax: 0.10.0
libtpu: 0.0.40
codegen_flags: <defaults>
</compile_context>

<pallas_src>
import math

import jax
import jax.numpy as jnp
from jax.experimental import pallas as pl
from jax.experimental.pallas import tpu as pltpu


K_IN = 2048          # image feature channels out of the backbone
KC = 512             # layer-1 K chunk -> grid of 2048 // 512 = 4 steps


# ----------------------------------------------------------------------------
# small in-kernel helpers
# ----------------------------------------------------------------------------
def _mm(a, b):
    # a (M,K) @ b (K,N) on the MXU, f32 accumulate
    return jax.lax.dot_general(a, b, (((1,), (0,)), ((), ())),
                               preferred_element_type=jnp.float32)


def _mmT(a, b):
    # a (M,K) @ b (N,K)^T on the MXU (contract last dims), f32 accumulate
    return jax.lax.dot_general(a, b, (((1,), (1,)), ((), ())),
                               preferred_element_type=jnp.float32)


def _sum_all(x):
    # full reduction kept 2-D: (M,N) -> (1,1)
    return jnp.sum(jnp.sum(x, axis=1, keepdims=True), axis=0, keepdims=True)


def _log_softmax(x):
    m = jnp.max(x, axis=-1, keepdims=True)
    s = x - m
    return s - jnp.log(jnp.sum(jnp.exp(s), axis=-1, keepdims=True))


def _normalize(x):
    # F.normalize(dim=-1, eps=1e-12): x / max(||x||, 1e-12) == x * rsqrt(max(x.x, 1e-24))
    ss = jnp.sum(x * x, axis=-1, keepdims=True)
    return x * jax.lax.rsqrt(jnp.maximum(ss, 1e-24))


def _clip_loss(i_emb, t_emb, scale, ycol, yrow):
    # CLIP.forward: normalize, cosine logits, label flip, soft target q, four
    # batchmean KL divergences, averaged.  Returns a (1, 1) f32 array.
    i = _normalize(i_emb)
    t = _normalize(t_emb)
    bs = i.shape[0]
    logit_i2t = _mmT(i, t) * scale        # i_sh @ t_sh.T * scale
    logit_t2i = _mmT(t, i)                # t_sh @ i_sh.T   (no scale, as in reference)

    # label[k, j] = y[j]; rows with y[k] == 0 get 0 <-> nonzero flipped
    ones = jnp.ones((bs, bs), jnp.float32)
    yk = ycol * ones                      # y[k] constant along each row
    yj = yrow * ones                      # y[j] along columns
    flipped = jnp.where(yj == 0.0, 1.0, 0.0)
    label = jnp.where(yk == 0.0, flipped, yj)

    rowsum = jnp.sum(label, axis=-1, keepdims=True)
    ln = label * pl.reciprocal(rowsum, approx=True)
    logq = _log_softmax(ln)               # log softmax(label / rowsum), stable
    q = jnp.exp(logq)

    p1 = _log_softmax(logit_i2t)
    p2 = _log_softmax(logit_t2i)

    kl_p1_q = _sum_all(q * (logq - p1))
    kl_q_p1 = _sum_all(jnp.exp(p1) * (p1 - logq))
    kl_p2_q = _sum_all(q * (logq - p2))
    kl_q_p2 = _sum_all(jnp.exp(p2) * (p2 - logq))
    return (kl_p1_q + kl_q_p1 + kl_p2_q + kl_q_p2) * (0.25 / bs)


# ----------------------------------------------------------------------------
# fused Pallas kernel: the whole StageOne2 forward
#
# slab_w (bf16, 256x512):
#   [  0:128,   0:256] ssiw   fused [i_sp | i_sh] weights (in=128, out=256)
#   [  0:128, 256:512] sstw   fused [t_sh | t_sp] weights
#   [128:256,   0:128] w3t rows   0:128      [128:256, 128:256] w3t rows 128:256
#   [128:256, 256:384] tw1t (49->128, zero-padded)   [128:256, 384:512] tw2t
#
# slab_b (f32, 8x512):
#   [0,   0:512] b1
#   [1,   0:256] b2    [1, 256:384] b3    [1, 384:512] tb1
#   [2,   0:128] tb2   [2, 128:384] ssib  [2, 384] exp(logit_scale1)
#   [3,   0:256] sstb  [3, 256:260] cb    [3, 384] exp(logit_scale2)
#   [4:8, 0:256] cwiT (row0=[c1|0], row1=[0|c2])   [4:8, 256:512] cwtT (row2=[c3|0], row3=[0|c4])
# ----------------------------------------------------------------------------
def _stage_one2_kernel(pooled_ref, w1_ref, w2_ref, sw_ref, sb_ref,
                       t_ref, ycol_ref, yrow_ref, out_ref, acc_ref):
    k = pl.program_id(0)

    @pl.when(k == 0)
    def _():
        acc_ref[...] = jnp.zeros_like(acc_ref)

    # layer-1 partial product for this K chunk (bf16 x bf16 -> f32 accumulator)
    acc_ref[...] += _mm(pooled_ref[...], w1_ref[...])

    @pl.when(k == pl.num_programs(0) - 1)
    def _():
        bf16 = jnp.bfloat16

        # ---- ImgEncoder tail: (B,512) -> relu -> (B,256) -> relu -> (B,128) ----
        h1 = jnp.maximum(acc_ref[...] + sb_ref[0:1, :], 0.0)
        h2 = jnp.maximum(_mm(h1.astype(bf16), w2_ref[...]) + sb_ref[1:2, 0:256], 0.0)
        i_emb = (_mm(h2[:, 0:128].astype(bf16), sw_ref[128:256, 0:128])
                 + _mm(h2[:, 128:256].astype(bf16), sw_ref[128:256, 128:256])
                 + sb_ref[1:2, 256:384])

        # ---- TabEncoder: 128(pad of 49) -> 128 -> 128 ----
        th = jnp.maximum(_mm(t_ref[...], sw_ref[128:256, 256:384])
                         + sb_ref[1:2, 384:512], 0.0)
        t_emb = _mm(th.astype(bf16), sw_ref[128:256, 384:512]) + sb_ref[2:3, 0:128]

        ycol = ycol_ref[...]
        yrow = yrow_ref[...]
        scale1 = sb_ref[2:3, 384:385]        # (1,1) exp(logit_scale1)
        scale2 = sb_ref[3:4, 384:385]        # (1,1) exp(logit_scale2)

        # ---- CLIP loss on the raw embeddings ----
        loss1 = _clip_loss(i_emb, t_emb, scale1, ycol, yrow)

        # ---- SS heads fused: two (128, 256) matmuls ----
        i_ss = _mm(i_emb.astype(bf16), sw_ref[0:128, 0:256]) + sb_ref[2:3, 128:384]
        t_ss = _mm(t_emb.astype(bf16), sw_ref[0:128, 256:512]) + sb_ref[3:4, 0:256]
        i_sp, i_sh = i_ss[:, 0:128], i_ss[:, 128:256]
        t_sh, t_sp = t_ss[:, 0:128], t_ss[:, 128:256]

        # ---- Separate loss: mean of two Frobenius norms ----
        m1 = _mmT(t_sp, t_sh)
        m2 = _mmT(i_sp, i_sh)
        loss_sp = (jnp.sqrt(_sum_all(m1 * m1)) + jnp.sqrt(_sum_all(m2 * m2))) * 0.5

        # ---- CLIP loss on the shared embeddings ----
        loss_sh = _clip_loss(i_sh, t_sh, scale2, ycol, yrow)

        loss = (loss_sp + loss_sh + loss1) * (1.0 / 3.0)            # (1,1)

        # ---- 4 classifiers fused via (4, 256) transposed block weights ----
        cls = (_mmT(i_ss, sb_ref[4:8, 0:256]) + _mmT(t_ss, sb_ref[4:8, 256:512])
               + sb_ref[3:4, 256:260])                              # (B, 4)

        # ---- single lane-dense output slab: cols 0..3 = heads, col 4 = loss ----
        bsz = out_ref.shape[0]
        lane = jax.lax.broadcasted_iota(jnp.int32, (bsz, 128), 1)
        full = jnp.where(lane == 4, loss, 0.0)
        for c in range(4):
            full = jnp.where(lane == c, cls[:, c:c + 1], full)
        out_ref[...] = full


# ----------------------------------------------------------------------------
# parameters (deterministic, kaiming-normal fan_out like the reference init)
# ----------------------------------------------------------------------------
def _init_linear(key, din, dout):
    kw, kb = jax.random.split(key)
    w = jax.random.normal(kw, (dout, din), jnp.float32) * math.sqrt(2.0 / dout)
    bound = 1.0 / math.sqrt(din)
    b = jax.random.uniform(kb, (dout,), jnp.float32, -bound, bound)
    return w, b


def init_params(key):
    names_dims = [
        ("img_l1", 2048, 512), ("img_l2", 512, 256), ("img_l3", 256, 128),
        ("tab_l1", 49, 128), ("tab_l2", 128, 128),
        ("ss_i_sp", 128, 128), ("ss_i_sh", 128, 128),
        ("ss_t_sh", 128, 128), ("ss_t_sp", 128, 128),
        ("c1", 128, 1), ("c2", 128, 1), ("c3", 128, 1), ("c4", 128, 1),
    ]
    keys = jax.random.split(key, len(names_dims))
    params = {}
    for k, (name, din, dout) in zip(keys, names_dims):
        w, b = _init_linear(k, din, dout)
        params[name + "_w"], params[name + "_b"] = w, b
    params["logit_scale1"] = jnp.array(math.log(1.0 / 0.07), jnp.float32)
    params["logit_scale2"] = jnp.array(math.log(1.0 / 0.07), jnp.float32)
    return params


def prepare_params(p):
    """One-time conversion to kernel layout (NOT per forward):
       * w1t (2048,512) bf16, w2t (512,256) bf16 (big image weights)
       * slab_w (256,512) bf16: all remaining weights, pre-tiled
       * slab_b (8,512)  f32 : biases, exp'd logit scales, fused classifier weights."""
    f32 = jnp.float32

    def tr(w):  # (out, in) -> (in, out)
        return jnp.transpose(w)

    w1t = tr(p["img_l1_w"]).astype(jnp.bfloat16)        # (2048, 512)
    w2t = tr(p["img_l2_w"]).astype(jnp.bfloat16)        # (512, 256)

    ssiw = jnp.concatenate([tr(p["ss_i_sp_w"]), tr(p["ss_i_sh_w"])], axis=1)   # (128,256)
    sstw = jnp.concatenate([tr(p["ss_t_sh_w"]), tr(p["ss_t_sp_w"])], axis=1)   # (128,256)
    w3t = tr(p["img_l3_w"])                                                    # (256,128)
    tw1t = jnp.zeros((128, 128), f32).at[0:49, :].set(tr(p["tab_l1_w"]))       # padded
    tw2t = tr(p["tab_l2_w"])                                                   # (128,128)

    slab_w = jnp.zeros((256, 512), f32)
    slab_w = slab_w.at[0:128, 0:256].set(ssiw)
    slab_w = slab_w.at[0:128, 256:512].set(sstw)
    slab_w = slab_w.at[128:256, 0:128].set(w3t[0:128, :])
    slab_w = slab_w.at[128:256, 128:256].set(w3t[128:256, :])
    slab_w = slab_w.at[128:256, 256:384].set(tw1t)
    slab_w = slab_w.at[128:256, 384:512].set(tw2t)
    slab_w = slab_w.astype(jnp.bfloat16)

    slab_b = jnp.zeros((8, 512), f32)
    slab_b = slab_b.at[0, :].set(p["img_l1_b"])
    slab_b = slab_b.at[1, 0:256].set(p["img_l2_b"])
    slab_b = slab_b.at[1, 256:384].set(p["img_l3_b"])
    slab_b = slab_b.at[1, 384:512].set(p["tab_l1_b"])
    slab_b = slab_b.at[2, 0:128].set(p["tab_l2_b"])
    slab_b = slab_b.at[2, 128:384].set(jnp.concatenate([p["ss_i_sp_b"], p["ss_i_sh_b"]]))
    slab_b = slab_b.at[2, 384].set(jnp.exp(p["logit_scale1"]))
    slab_b = slab_b.at[3, 0:256].set(jnp.concatenate([p["ss_t_sh_b"], p["ss_t_sp_b"]]))
    slab_b = slab_b.at[3, 256:260].set(
        jnp.concatenate([p["c1_b"], p["c2_b"], p["c3_b"], p["c4_b"]]))
    slab_b = slab_b.at[3, 384].set(jnp.exp(p["logit_scale2"]))
    # fused classifier weights, transposed (4, 256) blocks
    slab_b = slab_b.at[4, 0:128].set(p["c1_w"][0])       # c1 acts on i_sp
    slab_b = slab_b.at[5, 128:256].set(p["c2_w"][0])     # c2 acts on i_sh
    slab_b = slab_b.at[6, 256:384].set(p["c3_w"][0])     # c3 acts on t_sh
    slab_b = slab_b.at[7, 384:512].set(p["c4_w"][0])     # c4 acts on t_sp

    return {"w1t": w1t, "w2t": w2t, "slab_w": slab_w, "slab_b": slab_b}


# ----------------------------------------------------------------------------
# StageOne2.forward (single fused pallas_call, 1-D grid over layer-1's K dim)
# ----------------------------------------------------------------------------
@jax.jit
def stage_one2_forward(kp, i_feat, t, y):
    """i_feat: (B, 2048, D, H, W) PENet feature volume; t: (B, 49); y: (B, 1)."""
    B = i_feat.shape[0]

    # AdaptiveAvgPool3d(1) + flatten as one tiny host-side reduce (no transpose/kron).
    pooled = jnp.mean(i_feat.astype(jnp.float32), axis=(2, 3, 4)).astype(jnp.bfloat16)

    # tab features zero-padded to a tile-aligned K=128 contraction
    t_pad = jnp.pad(t.astype(jnp.bfloat16), ((0, 0), (0, 128 - t.shape[1])))

    ycol = y.astype(jnp.float32).reshape(B, 1)
    yrow = y.astype(jnp.float32).reshape(1, B)

    kt = K_IN // KC
    out = pl.pallas_call(
        _stage_one2_kernel,
        grid=(kt,),
        out_shape=jax.ShapeDtypeStruct((B, 128), jnp.float32),
        in_specs=[
            pl.BlockSpec((B, KC), lambda k: (0, k)),       # pooled (chunked over K)
            pl.BlockSpec((KC, 512), lambda k: (k, 0)),     # w1t    (chunked over K)
            pl.BlockSpec((512, 256), lambda k: (0, 0)),    # w2t
            pl.BlockSpec((256, 512), lambda k: (0, 0)),    # bf16 weight slab
            pl.BlockSpec((8, 512), lambda k: (0, 0)),      # f32 bias/misc slab
            pl.BlockSpec((B, 128), lambda k: (0, 0)),      # padded tab features
            pl.BlockSpec((B, 1), lambda k: (0, 0)),        # y as column
            pl.BlockSpec((1, B), lambda k: (0, 0)),        # y as row
        ],
        out_specs=pl.BlockSpec((B, 128), lambda k: (0, 0)),
        scratch_shapes=[pltpu.VMEM((B, 512), jnp.float32)],
        compiler_params=pltpu.CompilerParams(
            dimension_semantics=("arbitrary",)),
    )(pooled, kp["w1t"], kp["w2t"], kp["slab_w"], kp["slab_b"], t_pad, ycol, yrow)

    loss = out[0, 4]
    i_sp_out = out[:, 0:1]
    i_sh_out = out[:, 1:2]
    t_sh_out = out[:, 2:3]
    t_sp_out = out[:, 3:4]
    # return order matches the PyTorch module
    return loss, i_sp_out, i_sh_out, t_sp_out, t_sh_out


# ----------------------------------------------------------------------------
if __name__ == "__main__":
    key = jax.random.PRNGKey(0)
    kparam, kimg, ktab = jax.random.split(key, 3)
    params = init_params(kparam)
    kparams = prepare_params(params)          # one-time layout/dtype prep

    B = 2
    # PENet feature volume (B, 2048, D, H, W) -- small spatial extent
    i_feat = jax.random.normal(kimg, (B, 2048, 1, 4, 4), jnp.float32)
    t_tab = jax.random.normal(ktab, (B, 49), jnp.float32)
    y = jnp.array([[1.0], [0.0]], dtype=jnp.float32)   # (B, 1) binary labels

    outs = stage_one2_forward(kparams, i_feat, t_tab, y)
    outs = jax.block_until_ready(outs)

    loss, i_sp_out, i_sh_out, t_sp_out, t_sh_out = outs
    assert loss.shape == ()
    assert i_sp_out.shape == (B, 1) and i_sh_out.shape == (B, 1)
    assert t_sp_out.shape == (B, 1) and t_sh_out.shape == (B, 1)
    assert bool(jnp.isfinite(loss))
    print("KERNEL_OK")
</pallas_src>

<mosaic_0001>
module attributes {stable_mosaic.version = 11 : i64} {
  func.func @_stage_one2_kernel(%arg0: i32, %arg1: memref<2x512xbf16, #tpu.memory_space<vmem>>, %arg2: memref<512x512xbf16, #tpu.memory_space<vmem>>, %arg3: memref<512x256xbf16, #tpu.memory_space<vmem>>, %arg4: memref<256x512xbf16, #tpu.memory_space<vmem>>, %arg5: memref<8x512xf32, #tpu.memory_space<vmem>>, %arg6: memref<2x128xbf16, #tpu.memory_space<vmem>>, %arg7: memref<2x1xf32, #tpu.memory_space<vmem>>, %arg8: memref<1x2xf32, #tpu.memory_space<vmem>>, %arg9: memref<2x128xf32, #tpu.memory_space<vmem>>, %arg10: memref<2x512xf32, #tpu.memory_space<vmem>>) attributes {dimension_semantics = [#tpu.dimension_semantics<arbitrary>], iteration_bounds = array<i64: 4>, scalar_prefetch = 0 : i64, scratch_operands = 1 : i64, tpu.core_type = #tpu.core_type<tc>, window_params = [{transform_indices = @transform_0, window_bounds = array<i64: 2, 512>}, {transform_indices = @transform_1, window_bounds = array<i64: 512, 512>}, {pipeline_mode = #tpu.pipeline_mode<synchronous>, transform_indices = @transform_2, window_bounds = array<i64: 512, 256>}, {pipeline_mode = #tpu.pipeline_mode<synchronous>, transform_indices = @transform_3, window_bounds = array<i64: 256, 512>}, {pipeline_mode = #tpu.pipeline_mode<synchronous>, transform_indices = @transform_4, window_bounds = array<i64: 8, 512>}, {pipeline_mode = #tpu.pipeline_mode<synchronous>, transform_indices = @transform_5, window_bounds = array<i64: 2, 128>}, {pipeline_mode = #tpu.pipeline_mode<synchronous>, transform_indices = @transform_6, window_bounds = array<i64: 2, 1>}, {pipeline_mode = #tpu.pipeline_mode<synchronous>, transform_indices = @transform_7, window_bounds = array<i64: 1, 2>}, {pipeline_mode = #tpu.pipeline_mode<synchronous>, transform_indices = @transform_8, window_bounds = array<i64: 2, 128>}]} {
    %c0_i32 = arith.constant 0 : i32
    %0 = arith.cmpi eq, %arg0, %c0_i32 : i32
    %1 = arith.extui %0 : i1 to i32
    %c0_i32_0 = arith.constant 0 : i32
    %2 = arith.cmpi ne, %1, %c0_i32_0 : i32
    scf.if %2 {
      %cst_9 = arith.constant 0.000000e+00 : f32
      %12 = vector.broadcast %cst_9 : f32 to vector<2x512xf32>
      %c0_10 = arith.constant 0 : index
      %c0_11 = arith.constant 0 : index
      %13 = vector.load %arg10[%c0_10, %c0_11] : memref<2x512xf32, #tpu.memory_space<vmem>>, vector<2x512xf32>
      tpu.vector_store %arg10[%c0_10, %c0_11], %12 {strides = array<i32>} : memref<2x512xf32, #tpu.memory_space<vmem>>, vector<2x512xf32>,
    } else {
    }
    %c0 = arith.constant 0 : index
    %c0_1 = arith.constant 0 : index
    %3 = vector.load %arg10[%c0, %c0_1] : memref<2x512xf32, #tpu.memory_space<vmem>>, vector<2x512xf32>
    %c0_2 = arith.constant 0 : index
    %c0_3 = arith.constant 0 : index
    %4 = vector.load %arg1[%c0_2, %c0_3] : memref<2x512xbf16, #tpu.memory_space<vmem>>, vector<2x512xbf16>
    %c0_4 = arith.constant 0 : index
    %c0_5 = arith.constant 0 : index
    %5 = vector.load %arg2[%c0_4, %c0_5] : memref<512x512xbf16, #tpu.memory_space<vmem>>, vector<512x512xbf16>
    %cst = arith.constant dense<0.000000e+00> : vector<2x512xf32>
    %6 = tpu.matmul %4, %5, %cst {dimension_numbers = #tpu.dot_dimension_numbers<[1], [0], [0], [1], [0, 0, 1, 1], [], []>} : vector<2x512xbf16>, vector<512x512xbf16>, vector<2x512xf32> -> vector<2x512xf32>
    %7 = arith.addf %3, %6 : vector<2x512xf32>
    %c0_6 = arith.constant 0 : index
    %c0_7 = arith.constant 0 : index
    %8 = vector.load %arg10[%c0_6, %c0_7] : memref<2x512xf32, #tpu.memory_space<vmem>>, vector<2x512xf32>
    tpu.vector_store %arg10[%c0_6, %c0_7], %7 {strides = array<i32>} : memref<2x512xf32, #tpu.memory_space<vmem>>, vector<2x512xf32>,
    %c3_i32 = arith.constant 3 : i32
    %9 = arith.cmpi eq, %arg0, %c3_i32 : i32
    %10 = arith.extui %9 : i1 to i32
    %c0_i32_8 = arith.constant 0 : i32
    %11 = arith.cmpi ne, %10, %c0_i32_8 : i32
    scf.if %11 {
      %c0_9 = arith.constant 0 : index
      %c0_10 = arith.constant 0 : index
      %12 = vector.load %arg10[%c0_9, %c0_10] : memref<2x512xf32, #tpu.memory_space<vmem>>, vector<2x512xf32>
      %c0_11 = arith.constant 0 : index
      %c0_12 = arith.constant 0 : index
      %13 = vector.load %arg5[%c0_11, %c0_12] : memref<8x512xf32, #tpu.memory_space<vmem>>, vector<1x512xf32>
      %14 = vector.broadcast %13 : vector<1x512xf32> to vector<2x512xf32>
      %15 = arith.addf %12, %14 : vector<2x512xf32>
      %cst_13 = arith.constant 0.000000e+00 : f32
      %16 = vector.broadcast %cst_13 : f32 to vector<2x512xf32>
      %17 = arith.maximumf %15, %16 : vector<2x512xf32>
      %18 = arith.truncf %17 : vector<2x512xf32> to vector<2x512xbf16>
      %c0_14 = arith.constant 0 : index
      %c0_15 = arith.constant 0 : index
      %19 = vector.load %arg3[%c0_14, %c0_15] : memref<512x256xbf16, #tpu.memory_space<vmem>>, vector<512x256xbf16>
      %cst_16 = arith.constant dense<0.000000e+00> : vector<2x256xf32>
      %20 = tpu.matmul %18, %19, %cst_16 {dimension_numbers = #tpu.dot_dimension_numbers<[1], [0], [0], [1], [0, 0, 1, 1], [], []>} : vector<2x512xbf16>, vector<512x256xbf16>, vector<2x256xf32> -> vector<2x256xf32>
      %c1 = arith.constant 1 : index
      %c0_17 = arith.constant 0 : index
      %21 = vector.load %arg5[%c1, %c0_17] : memref<8x512xf32, #tpu.memory_space<vmem>>, vector<1x256xf32>
      %22 = vector.broadcast %21 : vector<1x256xf32> to vector<2x256xf32>
      %23 = arith.addf %20, %22 : vector<2x256xf32>
      %cst_18 = arith.constant 0.000000e+00 : f32
      %24 = vector.broadcast %cst_18 : f32 to vector<2x256xf32>
      %25 = arith.maximumf %23, %24 : vector<2x256xf32>
      %26 = vector.extract_strided_slice %25 {offsets = [0, 0], sizes = [2, 128], strides = [1, 1]} : vector<2x256xf32> to vector<2x128xf32>
      %27 = arith.truncf %26 : vector<2x128xf32> to vector<2x128xbf16>
      %c128 = arith.constant 128 : index
      %c0_19 = arith.constant 0 : index
      %28 = vector.load %arg4[%c128, %c0_19] : memref<256x512xbf16, #tpu.memory_space<vmem>>, vector<128x128xbf16>
      %cst_20 = arith.constant dense<0.000000e+00> : vector<2x128xf32>
      %29 = tpu.matmul %27, %28, %cst_20 {dimension_numbers = #tpu.dot_dimension_numbers<[1], [0], [0], [1], [0, 0, 1, 1], [], []>} : vector<2x128xbf16>, vector<128x128xbf16>, vector<2x128xf32> -> vector<2x128xf32>
      %30 = vector.extract_strided_slice %25 {offsets = [0, 128], sizes = [2, 128], strides = [1, 1]} : vector<2x256xf32> to vector<2x128xf32>
      %31 = arith.truncf %30 : vector<2x128xf32> to vector<2x128xbf16>
      %c128_21 = arith.constant 128 : index
      %c128_22 = arith.constant 128 : index
      %32 = vector.load %arg4[%c128_21, %c128_22] : memref<256x512xbf16, #tpu.memory_space<vmem>>, vector<128x128xbf16>
      %cst_23 = arith.constant dense<0.000000e+00> : vector<2x128xf32>
      %33 = tpu.matmul %31, %32, %cst_23 {dimension_numbers = #tpu.dot_dimension_numbers<[1], [0], [0], [1], [0, 0, 1, 1], [], []>} : vector<2x128xbf16>, vector<128x128xbf16>, vector<2x128xf32> -> vector<2x128xf32>
      %34 = arith.addf %29, %33 : vector<2x128xf32>
      %c1_24 = arith.constant 1 : index
      %c256 = arith.constant 256 : index
      %35 = vector.load %arg5[%c1_24, %c256] : memref<8x512xf32, #tpu.memory_space<vmem>>, vector<1x128xf32>
      %36 = vector.broadcast %35 : vector<1x128xf32> to vector<2x128xf32>
      %37 = arith.addf %34, %36 : vector<2x128xf32>
      %c0_25 = arith.constant 0 : index
      %c0_26 = arith.constant 0 : index
      %38 = vector.load %arg6[%c0_25, %c0_26] : memref<2x128xbf16, #tpu.memory_space<vmem>>, vector<2x128xbf16>
      %c128_27 = arith.constant 128 : index
      %c256_28 = arith.constant 256 : index
      %39 = vector.load %arg4[%c128_27, %c256_28] : memref<256x512xbf16, #tpu.memory_space<vmem>>, vector<128x128xbf16>
      %cst_29 = arith.constant dense<0.000000e+00> : vector<2x128xf32>
      %40 = tpu.matmul %38, %39, %cst_29 {dimension_numbers = #tpu.dot_dimension_numbers<[1], [0], [0], [1], [0, 0, 1, 1], [], []>} : vector<2x128xbf16>, vector<128x128xbf16>, vector<2x128xf32> -> vector<2x128xf32>
      %c1_30 = arith.constant 1 : index
      %c384 = arith.constant 384 : index
      %41 = vector.load %arg5[%c1_30, %c384] : memref<8x512xf32, #tpu.memory_space<vmem>>, vector<1x128xf32>
      %42 = vector.broadcast %41 : vector<1x128xf32> to vector<2x128xf32>
      %43 = arith.addf %40, %42 : vector<2x128xf32>
      %cst_31 = arith.constant 0.000000e+00 : f32
      %44 = vector.broadcast %cst_31 : f32 to vector<2x128xf32>
      %45 = arith.maximumf %43, %44 : vector<2x128xf32>
      %46 = arith.truncf %45 : vector<2x128xf32> to vector<2x128xbf16>
      %c128_32 = arith.constant 128 : index
      %c384_33 = arith.constant 384 : index
      %47 = vector.load %arg4[%c128_32, %c384_33] : memref<256x512xbf16, #tpu.memory_space<vmem>>, vector<128x128xbf16>
      %cst_34 = arith.constant dense<0.000000e+00> : vector<2x128xf32>
      %48 = tpu.matmul %46, %47, %cst_34 {dimension_numbers = #tpu.dot_dimension_numbers<[1], [0], [0], [1], [0, 0, 1, 1], [], []>} : vector<2x128xbf16>, vector<128x128xbf16>, vector<2x128xf32> -> vector<2x128xf32>
      %c2 = arith.constant 2 : index
      %c0_35 = arith.constant 0 : index
      %49 = vector.load %arg5[%c2, %c0_35] : memref<8x512xf32, #tpu.memory_space<vmem>>, vector<1x128xf32>
      %50 = vector.broadcast %49 : vector<1x128xf32> to vector<2x128xf32>
      %51 = arith.addf %48, %50 : vector<2x128xf32>
      %c0_36 = arith.constant 0 : index
      %c0_37 = arith.constant 0 : index
      %52 = vector.load %arg7[%c0_36, %c0_37] : memref<2x1xf32, #tpu.memory_space<vmem>>, vector<2x1xf32>
      %c0_38 = arith.constant 0 : index
      %c0_39 = arith.constant 0 : index
      %53 = vector.load %arg8[%c0_38, %c0_39] : memref<1x2xf32, #tpu.memory_space<vmem>>, vector<1x2xf32>
      %c2_40 = arith.constant 2 : index
      %c384_41 = arith.constant 384 : index
      %54 = vector.load %arg5[%c2_40, %c384_41] : memref<8x512xf32, #tpu.memory_space<vmem>>, vector<1x1xf32>
      %c3 = arith.constant 3 : index
      %c384_42 = arith.constant 384 : index
      %55 = vector.load %arg5[%c3, %c384_42] : memref<8x512xf32, #tpu.memory_space<vmem>>, vector<1x1xf32>
      %56 = arith.mulf %37, %37 : vector<2x128xf32>
      %cst_43 = arith.constant dense<0.000000e+00> : vector<2xf32>
      %57 = vector.multi_reduction <add>, %56, %cst_43 [1] : vector<2x128xf32> to vector<2xf32>
      %58 = vector.shape_cast %57 : vector<2xf32> to vector<2x1xf32>
      %cst_44 = arith.constant 1.000000e-24 : f32
      %59 = vector.broadcast %cst_44 : f32 to vector<2x1xf32>
      %60 = arith.maximumf %58, %59 : vector<2x1xf32>
      %61 = math.rsqrt %60 : vector<2x1xf32>
      %62 = vector.broadcast %61 : vector<2x1xf32> to vector<2x128xf32>
      %63 = arith.mulf %37, %62 : vector<2x128xf32>
      %64 = arith.mulf %51, %51 : vector<2x128xf32>
      %cst_45 = arith.constant dense<0.000000e+00> : vector<2xf32>
      %65 = vector.multi_reduction <add>, %64, %cst_45 [1] : vector<2x128xf32> to vector<2xf32>
      %66 = vector.shape_cast %65 : vector<2xf32> to vector<2x1xf32>
      %cst_46 = arith.constant 1.000000e-24 : f32
      %67 = vector.broadcast %cst_46 : f32 to vector<2x1xf32>
      %68 = arith.maximumf %66, %67 : vector<2x1xf32>
      %69 = math.rsqrt %68 : vector<2x1xf32>
      %70 = vector.broadcast %69 : vector<2x1xf32> to vector<2x128xf32>
      %71 = arith.mulf %51, %70 : vector<2x128xf32>
      %cst_47 = arith.constant dense<0.000000e+00> : vector<2x2xf32>
      %72 = tpu.matmul %63, %71, %cst_47 {dimension_numbers = #tpu.dot_dimension_numbers<[1], [1], [0], [0], [0, 0, 1, 0], [], []>} : vector<2x128xf32>, vector<2x128xf32>, vector<2x2xf32> -> vector<2x2xf32>
      %73 = vector.broadcast %54 : vector<1x1xf32> to vector<2x2xf32>
      %74 = arith.mulf %72, %73 : vector<2x2xf32>
      %cst_48 = arith.constant dense<0.000000e+00> : vector<2x2xf32>
      %75 = tpu.matmul %71, %63, %cst_48 {dimension_numbers = #tpu.dot_dimension_numbers<[1], [1], [0], [0], [0, 0, 1, 0], [], []>} : vector<2x128xf32>, vector<2x128xf32>, vector<2x2xf32> -> vector<2x2xf32>
      %cst_49 = arith.constant 1.000000e+00 : f32
      %76 = vector.broadcast %cst_49 : f32 to vector<2x2xf32>
      %77 = vector.broadcast %52 : vector<2x1xf32> to vector<2x2xf32>
      %78 = arith.mulf %77, %76 : vector<2x2xf32>
      %79 = vector.broadcast %53 : vector<1x2xf32> to vector<2x2xf32>
      %80 = arith.mulf %79, %76 : vector<2x2xf32>
      %cst_50 = arith.constant 0.000000e+00 : f32
      %81 = vector.broadcast %cst_50 : f32 to vector<2x2xf32>
      %82 = arith.cmpf oeq, %80, %81 : vector<2x2xf32>
      %cst_51 = arith.constant 1.000000e+00 : f32
      %cst_52 = arith.constant 0.000000e+00 : f32
      %83 = vector.broadcast %cst_51 : f32 to vector<2x2xf32>
      %84 = vector.broadcast %cst_52 : f32 to vector<2x2xf32>
      %85 = arith.select %82, %83, %84 : vector<2x2xi1>, vector<2x2xf32>
      %cst_53 = arith.constant 0.000000e+00 : f32
      %86 = vector.broadcast %cst_53 : f32 to vector<2x2xf32>
      %87 = arith.cmpf oeq, %78, %86 : vector<2x2xf32>
      %88 = arith.select %87, %85, %80 : vector<2x2xi1>, vector<2x2xf32>
      %cst_54 = arith.constant dense<0.000000e+00> : vector<2xf32>
      %89 = vector.multi_reduction <add>, %88, %cst_54 [1] : vector<2x2xf32> to vector<2xf32>
      %90 = vector.shape_cast %89 : vector<2xf32> to vector<2x1xf32>
      %91 = tpu.reciprocal %90 {approx = true} : vector<2x1xf32> -> vector<2x1xf32>
      %92 = vector.broadcast %91 : vector<2x1xf32> to vector<2x2xf32>
      %93 = arith.mulf %88, %92 : vector<2x2xf32>
      %cst_55 = arith.constant dense<0xFF800000> : vector<2xf32>
      %94 = vector.multi_reduction <maximumf>, %93, %cst_55 [1] : vector<2x2xf32> to vector<2xf32>
      %95 = vector.shape_cast %94 : vector<2xf32> to vector<2x1xf32>
      %96 = vector.broadcast %95 : vector<2x1xf32> to vector<2x2xf32>
      %97 = arith.subf %93, %96 : vector<2x2xf32>
      %98 = math.exp %97 : vector<2x2xf32>
      %cst_56 = arith.constant dense<0.000000e+00> : vector<2xf32>
      %99 = vector.multi_reduction <add>, %98, %cst_56 [1] : vector<2x2xf32> to vector<2xf32>
      %100 = vector.shape_cast %99 : vector<2xf32> to vector<2x1xf32>
      %101 = math.log %100 : vector<2x1xf32>
      %102 = vector.broadcast %101 : vector<2x1xf32> to vector<2x2xf32>
      %103 = arith.subf %97, %102 : vector<2x2xf32>
      %104 = math.exp %103 : vector<2x2xf32>
      %cst_57 = arith.constant dense<0xFF800000> : vector<2xf32>
      %105 = vector.multi_reduction <maximumf>, %74, %cst_57 [1] : vector<2x2xf32> to vector<2xf32>
      %106 = vector.shape_cast %105 : vector<2xf32> to vector<2x1xf32>
      %107 = vector.broadcast %106 : vector<2x1xf32> to vector<2x2xf32>
      %108 = arith.subf %74, %107 : vector<2x2xf32>
      %109 = math.exp %108 : vector<2x2xf32>
      %cst_58 = arith.constant dense<0.000000e+00> : vector<2xf32>
      %110 = vector.multi_reduction <add>, %109, %cst_58 [1] : vector<2x2xf32> to vector<2xf32>
      %111 = vector.shape_cast %110 : vector<2xf32> to vector<2x1xf32>
      %112 = math.log %111 : vector<2x1xf32>
      %113 = vector.broadcast %112 : vector<2x1xf32> to vector<2x2xf32>
      %114 = arith.subf %108, %113 : vector<2x2xf32>
      %cst_59 = arith.constant dense<0xFF800000> : vector<2xf32>
      %115 = vector.multi_reduction <maximumf>, %75, %cst_59 [1] : vector<2x2xf32> to vector<2xf32>
      %116 = vector.shape_cast %115 : vector<2xf32> to vector<2x1xf32>
      %117 = vector.broadcast %116 : vector<2x1xf32> to vector<2x2xf32>
      %118 = arith.subf %75, %117 : vector<2x2xf32>
      %119 = math.exp %118 : vector<2x2xf32>
      %cst_60 = arith.constant dense<0.000000e+00> : vector<2xf32>
      %120 = vector.multi_reduction <add>, %119, %cst_60 [1] : vector<2x2xf32> to vector<2xf32>
      %121 = vector.shape_cast %120 : vector<2xf32> to vector<2x1xf32>
      %122 = math.log %121 : vector<2x1xf32>
      %123 = vector.broadcast %122 : vector<2x1xf32> to vector<2x2xf32>
      %124 = arith.subf %118, %123 : vector<2x2xf32>
      %125 = arith.subf %103, %114 : vector<2x2xf32>
      %126 = arith.mulf %104, %125 : vector<2x2xf32>
      %cst_61 = arith.constant dense<0.000000e+00> : vector<2xf32>
      %127 = vector.multi_reduction <add>, %126, %cst_61 [1] : vector<2x2xf32> to vector<2xf32>
      %128 = vector.shape_cast %127 : vector<2xf32> to vector<2x1xf32>
      %cst_62 = arith.constant dense<0.000000e+00> : vector<1xf32>
      %129 = vector.multi_reduction <add>, %128, %cst_62 [0] : vector<2x1xf32> to vector<1xf32>
      %130 = vector.shape_cast %129 : vector<1xf32> to vector<1x1xf32>
      %131 = math.exp %114 : vector<2x2xf32>
      %132 = arith.subf %114, %103 : vector<2x2xf32>
      %133 = arith.mulf %131, %132 : vector<2x2xf32>
      %cst_63 = arith.constant dense<0.000000e+00> : vector<2xf32>
      %134 = vector.multi_reduction <add>, %133, %cst_63 [1] : vector<2x2xf32> to vector<2xf32>
      %135 = vector.shape_cast %134 : vector<2xf32> to vector<2x1xf32>
      %cst_64 = arith.constant dense<0.000000e+00> : vector<1xf32>
      %136 = vector.multi_reduction <add>, %135, %cst_64 [0] : vector<2x1xf32> to vector<1xf32>
      %137 = vector.shape_cast %136 : vector<1xf32> to vector<1x1xf32>
      %138 = arith.subf %103, %124 : vector<2x2xf32>
      %139 = arith.mulf %104, %138 : vector<2x2xf32>
      %cst_65 = arith.constant dense<0.000000e+00> : vector<2xf32>
      %140 = vector.multi_reduction <add>, %139, %cst_65 [1] : vector<2x2xf32> to vector<2xf32>
      %141 = vector.shape_cast %140 : vector<2xf32> to vector<2x1xf32>
      %cst_66 = arith.constant dense<0.000000e+00> : vector<1xf32>
      %142 = vector.multi_reduction <add>, %141, %cst_66 [0] : vector<2x1xf32> to vector<1xf32>
      %143 = vector.shape_cast %142 : vector<1xf32> to vector<1x1xf32>
      %144 = math.exp %124 : vector<2x2xf32>
      %145 = arith.subf %124, %103 : vector<2x2xf32>
      %146 = arith.mulf %144, %145 : vector<2x2xf32>
      %cst_67 = arith.constant dense<0.000000e+00> : vector<2xf32>
      %147 = vector.multi_reduction <add>, %146, %cst_67 [1] : vector<2x2xf32> to vector<2xf32>
      %148 = vector.shape_cast %147 : vector<2xf32> to vector<2x1xf32>
      %cst_68 = arith.constant dense<0.000000e+00> : vector<1xf32>
      %149 = vector.multi_reduction <add>, %148, %cst_68 [0] : vector<2x1xf32> to vector<1xf32>
      %150 = vector.shape_cast %149 : vector<1xf32> to vector<1x1xf32>
      %151 = arith.addf %130, %137 : vector<1x1xf32>
      %152 = arith.addf %151, %143 : vector<1x1xf32>
      %153 = arith.addf %152, %150 : vector<1x1xf32>
      %cst_69 = arith.constant 1.250000e-01 : f32
      %154 = vector.broadcast %cst_69 : f32 to vector<1x1xf32>
      %155 = arith.mulf %153, %154 : vector<1x1xf32>
      %156 = arith.truncf %37 : vector<2x128xf32> to vector<2x128xbf16>
      %c0_70 = arith.constant 0 : index
      %c0_71 = arith.constant 0 : index
      %157 = vector.load %arg4[%c0_70, %c0_71] : memref<256x512xbf16, #tpu.memory_space<vmem>>, vector<128x256xbf16>
      %cst_72 = arith.constant dense<0.000000e+00> : vector<2x256xf32>
      %158 = tpu.matmul %156, %157, %cst_72 {dimension_numbers = #tpu.dot_dimension_numbers<[1], [0], [0], [1], [0, 0, 1, 1], [], []>} : vector<2x128xbf16>, vector<128x256xbf16>, vector<2x256xf32> -> vector<2x256xf32>
      %c2_73 = arith.constant 2 : index
      %c128_74 = arith.constant 128 : index
      %159 = vector.load %arg5[%c2_73, %c128_74] : memref<8x512xf32, #tpu.memory_space<vmem>>, vector<1x256xf32>
      %160 = vector.broadcast %159 : vector<1x256xf32> to vector<2x256xf32>
      %161 = arith.addf %158, %160 : vector<2x256xf32>
      %162 = arith.truncf %51 : vector<2x128xf32> to vector<2x128xbf16>
      %c0_75 = arith.constant 0 : index
      %c256_76 = arith.constant 256 : index
      %163 = vector.load %arg4[%c0_75, %c256_76] : memref<256x512xbf16, #tpu.memory_space<vmem>>, vector<128x256xbf16>
      %cst_77 = arith.constant dense<0.000000e+00> : vector<2x256xf32>
      %164 = tpu.matmul %162, %163, %cst_77 {dimension_numbers = #tpu.dot_dimension_numbers<[1], [0], [0], [1], [0, 0, 1, 1], [], []>} : vector<2x128xbf16>, vector<128x256xbf16>, vector<2x256xf32> -> vector<2x256xf32>
      %c3_78 = arith.constant 3 : index
      %c0_79 = arith.constant 0 : index
      %165 = vector.load %arg5[%c3_78, %c0_79] : memref<8x512xf32, #tpu.memory_space<vmem>>, vector<1x256xf32>
      %166 = vector.broadcast %165 : vector<1x256xf32> to vector<2x256xf32>
      %167 = arith.addf %164, %166 : vector<2x256xf32>
      %168 = vector.extract_strided_slice %161 {offsets = [0, 0], sizes = [2, 128], strides = [1, 1]} : vector<2x256xf32> to vector<2x128xf32>
      %169 = vector.extract_strided_slice %161 {offsets = [0, 128], sizes = [2, 128], strides = [1, 1]} : vector<2x256xf32> to vector<2x128xf32>
      %170 = vector.extract_strided_slice %167 {offsets = [0, 0], sizes = [2, 128], strides = [1, 1]} : vector<2x256xf32> to vector<2x128xf32>
      %171 = vector.extract_strided_slice %167 {offsets = [0, 128], sizes = [2, 128], strides = [1, 1]} : vector<2x256xf32> to vector<2x128xf32>
      %cst_80 = arith.constant dense<0.000000e+00> : vector<2x2xf32>
      %172 = tpu.matmul %171, %170, %cst_80 {dimension_numbers = #tpu.dot_dimension_numbers<[1], [1], [0], [0], [0, 0, 1, 0], [], []>} : vector<2x128xf32>, vector<2x128xf32>, vector<2x2xf32> -> vector<2x2xf32>
      %cst_81 = arith.constant dense<0.000000e+00> : vector<2x2xf32>
      %173 = tpu.matmul %168, %169, %cst_81 {dimension_numbers = #tpu.dot_dimension_numbers<[1], [1], [0], [0], [0, 0, 1, 0], [], []>} : vector<2x128xf32>, vector<2x128xf32>, vector<2x2xf32> -> vector<2x2xf32>
      %174 = arith.mulf %172, %172 : vector<2x2xf32>
      %cst_82 = arith.constant dense<0.000000e+00> : vector<2xf32>
      %175 = vector.multi_reduction <add>, %174, %cst_82 [1] : vector<2x2xf32> to vector<2xf32>
      %176 = vector.shape_cast %175 : vector<2xf32> to vector<2x1xf32>
      %cst_83 = arith.constant dense<0.000000e+00> : vector<1xf32>
      %177 = vector.multi_reduction <add>, %176, %cst_83 [0] : vector<2x1xf32> to vector<1xf32>
      %178 = vector.shape_cast %177 : vector<1xf32> to vector<1x1xf32>
      %179 = math.sqrt %178 : vector<1x1xf32>
      %180 = arith.mulf %173, %173 : vector<2x2xf32>
      %cst_84 = arith.constant dense<0.000000e+00> : vector<2xf32>
      %181 = vector.multi_reduction <add>, %180, %cst_84 [1] : vector<2x2xf32> to vector<2xf32>
      %182 = vector.shape_cast %181 : vector<2xf32> to vector<2x1xf32>
      %cst_85 = arith.constant dense<0.000000e+00> : vector<1xf32>
      %183 = vector.multi_reduction <add>, %182, %cst_85 [0] : vector<2x1xf32> to vector<1xf32>
      %184 = vector.shape_cast %183 : vector<1xf32> to vector<1x1xf32>
      %185 = math.sqrt %184 : vector<1x1xf32>
      %186 = arith.addf %179, %185 : vector<1x1xf32>
      %cst_86 = arith.constant 5.000000e-01 : f32
      %187 = vector.broadcast %cst_86 : f32 to vector<1x1xf32>
      %188 = arith.mulf %186, %187 : vector<1x1xf32>
      %189 = arith.mulf %169, %169 : vector<2x128xf32>
      %cst_87 = arith.constant dense<0.000000e+00> : vector<2xf32>
      %190 = vector.multi_reduction <add>, %189, %cst_87 [1] : vector<2x128xf32> to vector<2xf32>
      %191 = vector.shape_cast %190 : vector<2xf32> to vector<2x1xf32>
      %cst_88 = arith.constant 1.000000e-24 : f32
      %192 = vector.broadcast %cst_88 : f32 to vector<2x1xf32>
      %193 = arith.maximumf %191, %192 : vector<2x1xf32>
      %194 = math.rsqrt %193 : vector<2x1xf32>
      %195 = vector.broadcast %194 : vector<2x1xf32> to vector<2x128xf32>
      %196 = arith.mulf %169, %195 : vector<2x128xf32>
      %197 = arith.mulf %170, %170 : vector<2x128xf32>
      %cst_89 = arith.constant dense<0.000000e+00> : vector<2xf32>
      %198 = vector.multi_reduction <add>, %197, %cst_89 [1] : vector<2x128xf32> to vector<2xf32>
      %199 = vector.shape_cast %198 : vector<2xf32> to vector<2x1xf32>
      %cst_90 = arith.constant 1.000000e-24 : f32
      %200 = vector.broadcast %cst_90 : f32 to vector<2x1xf32>
      %201 = arith.maximumf %199, %200 : vector<2x1xf32>
      %202 = math.rsqrt %201 : vector<2x1xf32>
      %203 = vector.broadcast %202 : vector<2x1xf32> to vector<2x128xf32>
      %204 = arith.mulf %170, %203 : vector<2x128xf32>
      %cst_91 = arith.constant dense<0.000000e+00> : vector<2x2xf32>
      %205 = tpu.matmul %196, %204, %cst_91 {dimension_numbers = #tpu.dot_dimension_numbers<[1], [1], [0], [0], [0, 0, 1, 0], [], []>} : vector<2x128xf32>, vector<2x128xf32>, vector<2x2xf32> -> vector<2x2xf32>
      %206 = vector.broadcast %55 : vector<1x1xf32> to vector<2x2xf32>
      %207 = arith.mulf %205, %206 : vector<2x2xf32>
      %cst_92 = arith.constant dense<0.000000e+00> : vector<2x2xf32>
      %208 = tpu.matmul %204, %196, %cst_92 {dimension_numbers = #tpu.dot_dimension_numbers<[1], [1], [0], [0], [0, 0, 1, 0], [], []>} : vector<2x128xf32>, vector<2x128xf32>, vector<2x2xf32> -> vector<2x2xf32>
      %cst_93 = arith.constant 1.000000e+00 : f32
      %209 = vector.broadcast %cst_93 : f32 to vector<2x2xf32>
      %210 = vector.broadcast %52 : vector<2x1xf32> to vector<2x2xf32>
      %211 = arith.mulf %210, %209 : vector<2x2xf32>
      %212 = vector.broadcast %53 : vector<1x2xf32> to vector<2x2xf32>
      %213 = arith.mulf %212, %209 : vector<2x2xf32>
      %cst_94 = arith.constant 0.000000e+00 : f32
      %214 = vector.broadcast %cst_94 : f32 to vector<2x2xf32>
      %215 = arith.cmpf oeq, %213, %214 : vector<2x2xf32>
      %cst_95 = arith.constant 1.000000e+00 : f32
      %cst_96 = arith.constant 0.000000e+00 : f32
      %216 = vector.broadcast %cst_95 : f32 to vector<2x2xf32>
      %217 = vector.broadcast %cst_96 : f32 to vector<2x2xf32>
      %218 = arith.select %215, %216, %217 : vector<2x2xi1>, vector<2x2xf32>
      %cst_97 = arith.constant 0.000000e+00 : f32
      %219 = vector.broadcast %cst_97 : f32 to vector<2x2xf32>
      %220 = arith.cmpf oeq, %211, %219 : vector<2x2xf32>
      %221 = arith.select %220, %218, %213 : vector<2x2xi1>, vector<2x2xf32>
      %cst_98 = arith.constant dense<0.000000e+00> : vector<2xf32>
      %222 = vector.multi_reduction <add>, %221, %cst_98 [1] : vector<2x2xf32> to vector<2xf32>
      %223 = vector.shape_cast %222 : vector<2xf32> to vector<2x1xf32>
      %224 = tpu.reciprocal %223 {approx = true} : vector<2x1xf32> -> vector<2x1xf32>
      %225 = vector.broadcast %224 : vector<2x1xf32> to vector<2x2xf32>
      %226 = arith.mulf %221, %225 : vector<2x2xf32>
      %cst_99 = arith.constant dense<0xFF800000> : vector<2xf32>
      %227 = vector.multi_reduction <maximumf>, %226, %cst_99 [1] : vector<2x2xf32> to vector<2xf32>
      %228 = vector.shape_cast %227 : vector<2xf32> to vector<2x1xf32>
      %229 = vector.broadcast %228 : vector<2x1xf32> to vector<2x2xf32>
      %230 = arith.subf %226, %229 : vector<2x2xf32>
      %231 = math.exp %230 : vector<2x2xf32>
      %cst_100 = arith.constant dense<0.000000e+00> : vector<2xf32>
      %232 = vector.multi_reduction <add>, %231, %cst_100 [1] : vector<2x2xf32> to vector<2xf32>
      %233 = vector.shape_cast %232 : vector<2xf32> to vector<2x1xf32>
      %234 = math.log %233 : vector<2x1xf32>
      %235 = vector.broadcast %234 : vector<2x1xf32> to vector<2x2xf32>
      %236 = arith.subf %230, %235 : vector<2x2xf32>
      %237 = math.exp %236 : vector<2x2xf32>
      %cst_101 = arith.constant dense<0xFF800000> : vector<2xf32>
      %238 = vector.multi_reduction <maximumf>, %207, %cst_101 [1] : vector<2x2xf32> to vector<2xf32>
      %239 = vector.shape_cast %238 : vector<2xf32> to vector<2x1xf32>
      %240 = vector.broadcast %239 : vector<2x1xf32> to vector<2x2xf32>
      %241 = arith.subf %207, %240 : vector<2x2xf32>
      %242 = math.exp %241 : vector<2x2xf32>
      %cst_102 = arith.constant dense<0.000000e+00> : vector<2xf32>
      %243 = vector.multi_reduction <add>, %242, %cst_102 [1] : vector<2x2xf32> to vector<2xf32>
      %244 = vector.shape_cast %243 : vector<2xf32> to vector<2x1xf32>
      %245 = math.log %244 : vector<2x1xf32>
      %246 = vector.broadcast %245 : vector<2x1xf32> to vector<2x2xf32>
      %247 = arith.subf %241, %246 : vector<2x2xf32>
      %cst_103 = arith.constant dense<0xFF800000> : vector<2xf32>
      %248 = vector.multi_reduction <maximumf>, %208, %cst_103 [1] : vector<2x2xf32> to vector<2xf32>
      %249 = vector.shape_cast %248 : vector<2xf32> to vector<2x1xf32>
      %250 = vector.broadcast %249 : vector<2x1xf32> to vector<2x2xf32>
      %251 = arith.subf %208, %250 : vector<2x2xf32>
      %252 = math.exp %251 : vector<2x2xf32>
      %cst_104 = arith.constant dense<0.000000e+00> : vector<2xf32>
      %253 = vector.multi_reduction <add>, %252, %cst_104 [1] : vector<2x2xf32> to vector<2xf32>
      %254 = vector.shape_cast %253 : vector<2xf32> to vector<2x1xf32>
      %255 = math.log %254 : vector<2x1xf32>
      %256 = vector.broadcast %255 : vector<2x1xf32> to vector<2x2xf32>
      %257 = arith.subf %251, %256 : vector<2x2xf32>
      %258 = arith.subf %236, %247 : vector<2x2xf32>
      %259 = arith.mulf %237, %258 : vector<2x2xf32>
      %cst_105 = arith.constant dense<0.000000e+00> : vector<2xf32>
      %260 = vector.multi_reduction <add>, %259, %cst_105 [1] : vector<2x2xf32> to vector<2xf32>
      %261 = vector.shape_cast %260 : vector<2xf32> to vector<2x1xf32>
      %cst_106 = arith.constant dense<0.000000e+00> : vector<1xf32>
      %262 = vector.multi_reduction <add>, %261, %cst_106 [0] : vector<2x1xf32> to vector<1xf32>
      %263 = vector.shape_cast %262 : vector<1xf32> to vector<1x1xf32>
      %264 = math.exp %247 : vector<2x2xf32>
      %265 = arith.subf %247, %236 : vector<2x2xf32>
      %266 = arith.mulf %264, %265 : vector<2x2xf32>
      %cst_107 = arith.constant dense<0.000000e+00> : vector<2xf32>
      %267 = vector.multi_reduction <add>, %266, %cst_107 [1] : vector<2x2xf32> to vector<2xf32>
      %268 = vector.shape_cast %267 : vector<2xf32> to vector<2x1xf32>
      %cst_108 = arith.constant dense<0.000000e+00> : vector<1xf32>
      %269 = vector.multi_reduction <add>, %268, %cst_108 [0] : vector<2x1xf32> to vector<1xf32>
      %270 = vector.shape_cast %269 : vector<1xf32> to vector<1x1xf32>
      %271 = arith.subf %236, %257 : vector<2x2xf32>
      %272 = arith.mulf %237, %271 : vector<2x2xf32>
      %cst_109 = arith.constant dense<0.000000e+00> : vector<2xf32>
      %273 = vector.multi_reduction <add>, %272, %cst_109 [1] : vector<2x2xf32> to vector<2xf32>
      %274 = vector.shape_cast %273 : vector<2xf32> to vector<2x1xf32>
      %cst_110 = arith.constant dense<0.000000e+00> : vector<1xf32>
      %275 = vector.multi_reduction <add>, %274, %cst_110 [0] : vector<2x1xf32> to vector<1xf32>
      %276 = vector.shape_cast %275 : vector<1xf32> to vector<1x1xf32>
      %277 = math.exp %257 : vector<2x2xf32>
      %278 = arith.subf %257, %236 : vector<2x2xf32>
      %279 = arith.mulf %277, %278 : vector<2x2xf32>
      %cst_111 = arith.constant dense<0.000000e+00> : vector<2xf32>
      %280 = vector.multi_reduction <add>, %279, %cst_111 [1] : vector<2x2xf32> to vector<2xf32>
      %281 = vector.shape_cast %280 : vector<2xf32> to vector<2x1xf32>
      %cst_112 = arith.constant dense<0.000000e+00> : vector<1xf32>
      %282 = vector.multi_reduction <add>, %281, %cst_112 [0] : vector<2x1xf32> to vector<1xf32>
      %283 = vector.shape_cast %282 : vector<1xf32> to vector<1x1xf32>
      %284 = arith.addf %263, %270 : vector<1x1xf32>
      %285 = arith.addf %284, %276 : vector<1x1xf32>
      %286 = arith.addf %285, %283 : vector<1x1xf32>
      %cst_113 = arith.constant 1.250000e-01 : f32
      %287 = vector.broadcast %cst_113 : f32 to vector<1x1xf32>
      %288 = arith.mulf %286, %287 : vector<1x1xf32>
      %289 = arith.addf %188, %288 : vector<1x1xf32>
      %290 = arith.addf %289, %155 : vector<1x1xf32>
      %cst_114 = arith.constant 0.333333343 : f32
      %291 = vector.broadcast %cst_114 : f32 to vector<1x1xf32>
      %292 = arith.mulf %290, %291 : vector<1x1xf32>
      %c4 = arith.constant 4 : index
      %c0_115 = arith.constant 0 : index
      %293 = vector.load %arg5[%c4, %c0_115] : memref<8x512xf32, #tpu.memory_space<vmem>>, vector<4x256xf32>
      %cst_116 = arith.constant dense<0.000000e+00> : vector<2x4xf32>
      %294 = tpu.matmul %161, %293, %cst_116 {dimension_numbers = #tpu.dot_dimension_numbers<[1], [1], [0], [0], [0, 0, 1, 0], [], []>} : vector<2x256xf32>, vector<4x256xf32>, vector<2x4xf32> -> vector<2x4xf32>
      %c4_117 = arith.constant 4 : index
      %c256_118 = arith.constant 256 : index
      %295 = vector.load %arg5[%c4_117, %c256_118] : memref<8x512xf32, #tpu.memory_space<vmem>>, vector<4x256xf32>
      %cst_119 = arith.constant dense<0.000000e+00> : vector<2x4xf32>
      %296 = tpu.matmul %167, %295, %cst_119 {dimension_numbers = #tpu.dot_dimension_numbers<[1], [1], [0], [0], [0, 0, 1, 0], [], []>} : vector<2x256xf32>, vector<4x256xf32>, vector<2x4xf32> -> vector<2x4xf32>
      %297 = arith.addf %294, %296 : vector<2x4xf32>
      %c3_120 = arith.constant 3 : index
      %c256_121 = arith.constant 256 : index
      %298 = vector.load %arg5[%c3_120, %c256_121] : memref<8x512xf32, #tpu.memory_space<vmem>>, vector<1x4xf32>
      %299 = vector.broadcast %298 : vector<1x4xf32> to vector<2x4xf32>
      %300 = arith.addf %297, %299 : vector<2x4xf32>
      %301 = tpu.iota {dimensions = array<i32: 1>} : vector<2x128xi32>
      %c4_i32 = arith.constant 4 : i32
      %302 = vector.broadcast %c4_i32 : i32 to vector<2x128xi32>
      %303 = arith.cmpi eq, %301, %302 : vector<2x128xi32>
      %cst_122 = arith.constant 0.000000e+00 : f32
      %304 = vector.shape_cast %292 : vector<1x1xf32> to vector<1x1xf32>
      %305 = vector.broadcast %304 : vector<1x1xf32> to vector<2x128xf32>
      %306 = vector.broadcast %cst_122 : f32 to vector<2x128xf32>
      %307 = arith.select %303, %305, %306 : vector<2x128xi1>, vector<2x128xf32>
      %c0_i32_123 = arith.constant 0 : i32
      %308 = vector.broadcast %c0_i32_123 : i32 to vector<2x128xi32>
      %309 = arith.cmpi eq, %301, %308 : vector<2x128xi32>
      %310 = vector.extract_strided_slice %300 {offsets = [0, 0], sizes = [2, 1], strides = [1, 1]} : vector<2x4xf32> to vector<2x1xf32>
      %311 = vector.shape_cast %310 : vector<2x1xf32> to vector<2x1xf32>
      %312 = vector.broadcast %311 : vector<2x1xf32> to vector<2x128xf32>
      %313 = arith.select %309, %312, %307 : vector<2x128xi1>, vector<2x128xf32>
      %c1_i32 = arith.constant 1 : i32
      %314 = vector.broadcast %c1_i32 : i32 to vector<2x128xi32>
      %315 = arith.cmpi eq, %301, %314 : vector<2x128xi32>
      %316 = vector.extract_strided_slice %300 {offsets = [0, 1], sizes = [2, 1], strides = [1, 1]} : vector<2x4xf32> to vector<2x1xf32>
      %317 = vector.shape_cast %316 : vector<2x1xf32> to vector<2x1xf32>
      %318 = vector.broadcast %317 : vector<2x1xf32> to vector<2x128xf32>
      %319 = arith.select %315, %318, %313 : vector<2x128xi1>, vector<2x128xf32>
      %c2_i32 = arith.constant 2 : i32
      %320 = vector.broadcast %c2_i32 : i32 to vector<2x128xi32>
      %321 = arith.cmpi eq, %301, %320 : vector<2x128xi32>
      %322 = vector.extract_strided_slice %300 {offsets = [0, 2], sizes = [2, 1], strides = [1, 1]} : vector<2x4xf32> to vector<2x1xf32>
      %323 = vector.shape_cast %322 : vector<2x1xf32> to vector<2x1xf32>
      %324 = vector.broadcast %323 : vector<2x1xf32> to vector<2x128xf32>
      %325 = arith.select %321, %324, %319 : vector<2x128xi1>, vector<2x128xf32>
      %c3_i32_124 = arith.constant 3 : i32
      %326 = vector.broadcast %c3_i32_124 : i32 to vector<2x128xi32>
      %327 = arith.cmpi eq, %301, %326 : vector<2x128xi32>
      %328 = vector.extract_strided_slice %300 {offsets = [0, 3], sizes = [2, 1], strides = [1, 1]} : vector<2x4xf32> to vector<2x1xf32>
      %329 = vector.shape_cast %328 : vector<2x1xf32> to vector<2x1xf32>
      %330 = vector.broadcast %329 : vector<2x1xf32> to vector<2x128xf32>
      %331 = arith.select %327, %330, %325 : vector<2x128xi1>, vector<2x128xf32>
      %c0_125 = arith.constant 0 : index
      %c0_126 = arith.constant 0 : index
      %332 = vector.load %arg9[%c0_125, %c0_126] : memref<2x128xf32, #tpu.memory_space<vmem>>, vector<2x128xf32>
      tpu.vector_store %arg9[%c0_125, %c0_126], %331 {strides = array<i32>} : memref<2x128xf32, #tpu.memory_space<vmem>>, vector<2x128xf32>,
    } else {
    }
    return
  }
  func.func @transform_0(%arg0: i32) -> (i32, i32) {
    %c0_i32 = arith.constant 0 : i32
    %c0_i32_0 = arith.constant 0 : i32
    return %c0_i32, %arg0 : i32, i32
  }
  func.func @transform_1(%arg0: i32) -> (i32, i32) {
    %c0_i32 = arith.constant 0 : i32
    %c0_i32_0 = arith.constant 0 : i32
    return %arg0, %c0_i32 : i32, i32
  }
  func.func @transform_2(%arg0: i32) -> (i32, i32) {
    %c0_i32 = arith.constant 0 : i32
    %c0_i32_0 = arith.constant 0 : i32
    %c0_i32_1 = arith.constant 0 : i32
    return %c0_i32, %c0_i32_0 : i32, i32
  }
  func.func @transform_3(%arg0: i32) -> (i32, i32) {
    %c0_i32 = arith.constant 0 : i32
    %c0_i32_0 = arith.constant 0 : i32
    %c0_i32_1 = arith.constant 0 : i32
    return %c0_i32, %c0_i32_0 : i32, i32
  }
  func.func @transform_4(%arg0: i32) -> (i32, i32) {
    %c0_i32 = arith.constant 0 : i32
    %c0_i32_0 = arith.constant 0 : i32
    %c0_i32_1 = arith.constant 0 : i32
    return %c0_i32, %c0_i32_0 : i32, i32
  }
  func.func @transform_5(%arg0: i32) -> (i32, i32) {
    %c0_i32 = arith.constant 0 : i32
    %c0_i32_0 = arith.constant 0 : i32
    %c0_i32_1 = arith.constant 0 : i32
    return %c0_i32, %c0_i32_0 : i32, i32
  }
  func.func @transform_6(%arg0: i32) -> (i32, i32) {
    %c0_i32 = arith.constant 0 : i32
    %c0_i32_0 = arith.constant 0 : i32
    %c0_i32_1 = arith.constant 0 : i32
    return %c0_i32, %c0_i32_0 : i32, i32
  }
  func.func @transform_7(%arg0: i32) -> (i32, i32) {
    %c0_i32 = arith.constant 0 : i32
    %c0_i32_0 = arith.constant 0 : i32
    %c0_i32_1 = arith.constant 0 : i32
    return %c0_i32, %c0_i32_0 : i32, i32
  }
  func.func @transform_8(%arg0: i32) -> (i32, i32) {
    %c0_i32 = arith.constant 0 : i32
    %c0_i32_0 = arith.constant 0 : i32
    %c0_i32_1 = arith.constant 0 : i32
    return %c0_i32, %c0_i32_0 : i32, i32
  }
}

</mosaic_0001>

<bundles_post_ra>
// kernel: stage_one2_forward.1
= control target key start
LH: loop header
LB: loop body
LE: loop exit
PB: predicated region body
PF: predicated region fallthrough
CT: control target
= control target key end

     0   :  { %13 = vsyncpa [#allocation4], 0  ;;  %s5427_s0 = inlined_call_operand.vmem [shape: bf16[2,2048], index: 0, kind: input, shape index: {}]   ;;  %s5428_s1 = inlined_call_operand.hbm [shape: bf16[2048,512], index: 1, kind: input, shape index: {}]   ;;  %s5429_s2 = inlined_call_operand.hbm [shape: bf16[512,256], index: 2, kind: input, shape index: {}]   ;;  %s5430_s3 = inlined_call_operand.hbm [shape: bf16[256,512], index: 3, kind: input, shape index: {}]   ;;  %s5431_s4 = inlined_call_operand.hbm [shape: f32[8,512], index: 4, kind: input, shape index: {}]   ;;  %s5432_s5 = inlined_call_operand.vmem [shape: bf16[2,128], index: 5, kind: input, shape index: {}]   ;;  %s5433_s6 = inlined_call_operand.vmem [shape: f32[2,1], index: 6, kind: input, shape index: {}]   ;;  %s5434_s7 = inlined_call_operand.hbm [shape: f32[1,2], index: 7, kind: input, shape index: {}]   ;;  %s5435_s8 = inlined_call_operand.vmem [shape: f32[2,128], index: 8, kind: output, shape index: {}]  }
   0x1   :  { %15 = vsyncpa [#allocation4 + $0x1], 0 }
   0x2   :  { %16 = vsyncpa [#allocation6], 0 }
   0x3   :  { %17 = vsyncpa [#allocation9], 0  ;;  %s4844_s27 = smov 0   ;;  %s4846_s28 = smov 0  }
   0x4   :  { %s4848_s29 = smov 0   ;;  %s4850_s30 = smov 0  }
   0x5 LB: > { %s4863_s9 = sadd.s32 4294967295, %s4779_s30   ;;  %p69_p0 = scmp.ne.s32.totalorder %s4771_s28, %s4767_s27  ;;  %s4779_s30 = sphi %s4850_s30, %s5454_s30   ;;  %s4775_s29 = sphi %s4848_s29, %s5453_s29   ;;  %s4771_s28 = sphi %s4846_s28, %s5452_s28   ;;  %s4767_s27 = sphi %s4844_s27, %s5451_s27  }
   0x6   : > { %p5436_p1 = scmp.eq.s32.totalorder %s4863_s9, 0  ;;  %p3632_p2 = scmp.ge.s32.totalorder %s4779_s30, 1 }
   0x7   : > { %p227_p3 = scmp.lt.s32.totalorder %s4779_s30, 5  ;;  %s4781_s12 = smov [#allocation5]  }
   0x8   : > { %p4872_p5 = por %p5436_p1, %p69_p0  ;;  %s239_s13 = sshll.u32 %s4781_s12, 4  ;;  %s4880_s13 = int_to_ptr.vmem [resolvable:$true] %s239_s13 }
   0x9   : > { %p4876_p6 = pnand %p3632_p2, %p227_p3  ;;  %s4782_s15 = smov [#allocation8]  }
   0xa   : > { %s5439_s10 = scalar_select %p4872_p5, 1, 0 }
   0xb   : > { %s5440_s11 = scalar_select %p4876_p6, 1, 0 }
   0xc   : > { %p4103_p7 = pneg %p4876_p6  ;;  %s266_s16 = sshll.u32 %s4782_s15, 4  ;;  %s4890_s16 = int_to_ptr.vmem [resolvable:$true] %s266_s16 }
   0xd   : > { %s4783_s17 = smov [#allocation7]   ;;  %s4595_s21 = scalar_lea.hbm %s5429_s2, 8192 }
   0xe   : > { %p4886_p8 = pnand %p4103_p7, %p5436_p1  ;;  %s4892_s18 = sshll.u32 %s4783_s17, 4  ;;  %s253_s18 = int_to_ptr.vmem [resolvable:$true] %s4892_s18 }
   0xf   : > { %p4596_p9 = scmp.ne.s32.totalorder %s5429_s2, %s4595_s21  ;;  %p4602_p13 = scmp.lt.u32.totalorder %s4595_s21, %s5429_s2 }
  0x10   : > { %p4902_p10 = pneg %p4886_p8 }
  0x12   : > { %p4598_p11 = pnand %p4902_p10, %p4596_p9 }
  0x14   : > { %p4599_p12 = pneg %p4598_p11 }
  0x16   : > { %p4604_p0 = pnand %p4602_p13, %p4599_p12 }
  0x18   : > { %4607 = shalt.err (!%p4604_p0)
}
  0x19   : > { %s4608_s27 = scalar_lea.vmem %s4880_s13, 8192  ;;  %p4616_p4 = scmp.lt.s32.totalorder %s4880_s13, %s4880_s13 }
  0x1a   : > { %p4609_p2 = scmp.ne.s32.totalorder %s4880_s13, %s4608_s27  ;;  %p4617_p1 = scmp.lt.s32.totalorder %s4608_s27, %s4608_s27 }
  0x1c   : > { %p4611_p3 = pnand %p4609_p2, %p4902_p10  ;;  %p4618_p9 = por %p4617_p1, %p4616_p4 }
  0x1e   : > { %p4612_p7 = pneg %p4611_p3 }
  0x20   : > { %p4619_p11 = pnand %p4618_p9, %p4612_p7 }
  0x22   : > { %4622 = shalt.err (!%p4619_p11)
}
  0x23   : > { %s4784_s12 = smov 128   ;;  %s4785_s15 = smov 8  }
  0x24   : > { %4106 = dma.hbm_to_vmem [thread:$0]  (!%p4886_p8), %s5429_s2, 8192, %s4880_s13, [#allocation6], %s4784_s12, %s4784_s12, %s4785_s15  }
  0x25   : > { %s4623_s22 = scalar_lea.hbm %s5431_s4, 512 }
  0x26   : > { %p4624_p1 = scmp.ne.s32.totalorder %s5431_s4, %s4623_s22  ;;  %p4630_p13 = scmp.lt.u32.totalorder %s4623_s22, %s5431_s4 }
  0x28   : > { %p4626_p4 = pnand %p4624_p1, %p4902_p10 }
  0x2a   : > { %p4627_p12 = pneg %p4626_p4 }
  0x2c   : > { %p4632_p0 = pnand %p4630_p13, %p4627_p12 }
  0x2e   : > { %4635 = shalt.err (!%p4632_p0)
}
  0x2f   : > { %s4636_s13 = scalar_lea.vmem %s4890_s16, 512  ;;  %p4644_p9 = scmp.lt.s32.totalorder %s4890_s16, %s4890_s16 }
  0x30   : > { %p4637_p2 = scmp.ne.s32.totalorder %s4890_s16, %s4636_s13  ;;  %p4645_p11 = scmp.lt.s32.totalorder %s4636_s13, %s4636_s13 }
  0x32   : > { %p4639_p3 = pnand %p4637_p2, %p4902_p10  ;;  %p4646_p1 = por %p4645_p11, %p4644_p9 }
  0x34   : > { %p4640_p7 = pneg %p4639_p3 }
  0x36   : > { %p4647_p4 = pnand %p4646_p1, %p4640_p7 }
  0x38   : > { %4650 = shalt.err (!%p4647_p4)
}
  0x39   : > { %4112 = dma.hbm_to_vmem [thread:$0]  (!%p4886_p8), %s5431_s4, 512, %s4890_s16, [#allocation9]  }
  0x3a   : > { %s4651_s20 = scalar_lea.hbm %s5430_s3, 8192 }
  0x3b   : > { %p4652_p12 = scmp.ne.s32.totalorder %s5430_s3, %s4651_s20  ;;  %p4658_p2 = scmp.lt.u32.totalorder %s4651_s20, %s5430_s3 }
  0x3d   : > { %p4654_p13 = pnand %p4652_p12, %p4902_p10 }
  0x3f   : > { %p4655_p0 = pneg %p4654_p13 }
  0x41   : > { %p4660_p3 = pnand %p4658_p2, %p4655_p0 }
  0x43   : > { %4663 = shalt.err (!%p4660_p3)
}
  0x44   : > { %s4664_s26 = scalar_lea.vmem %s253_s18, 8192  ;;  %p4672_p1 = scmp.lt.s32.totalorder %s253_s18, %s253_s18 }
  0x45   : > { %p4665_p7 = scmp.ne.s32.totalorder %s253_s18, %s4664_s26  ;;  %p4673_p4 = scmp.lt.s32.totalorder %s4664_s26, %s4664_s26 }
  0x47   : > { %p4667_p9 = pnand %p4665_p7, %p4902_p10  ;;  %p4674_p5 = por %p4673_p4, %p4672_p1 }
  0x49   : > { %p4668_p11 = pneg %p4667_p9 }
  0x4b   : > { %p4675_p6 = pnand %p4674_p5, %p4668_p11 }
  0x4d   : > { %4678 = shalt.err (!%p4675_p6)
}
  0x4e   : > { %s4786_s16 = smov 256   ;;  %s4787_s27 = smov 16  }
  0x4f   : > { %4109 = dma.hbm_to_vmem [thread:$0]  (!%p4886_p8), %s5430_s3, 8192, %s253_s18, [#allocation6], %s4786_s16, %s4786_s16, %s4787_s27  }
  0x50   : > { %s4788_s15 = smov [#allocation10]   ;;  %s4679_s21 = scalar_lea.hbm %s5434_s7, 16 }
  0x51   : > { %s283_s17 = sshll.u32 %s4788_s15, 4  ;;  %p4680_p5 = scmp.ne.s32.totalorder %s5434_s7, %s4679_s21  ;;  %s284_s17 = int_to_ptr.vmem [resolvable:$true] %s283_s17 }
  0x52   : > { %p4686_p13 = scmp.lt.u32.totalorder %s4679_s21, %s5434_s7 }
  0x53   : > { %p4682_p6 = pnand %p4680_p5, %p4902_p10 }
  0x55   : > { %p4683_p12 = pneg %p4682_p6 }
  0x57   : > { %p4688_p0 = pnand %p4686_p13, %p4683_p12 }
  0x59   : > { %4691 = shalt.err (!%p4688_p0)
}
  0x5a   : > { %s4692_s18 = scalar_lea.vmem %s284_s17, 16  ;;  %s4699_s13 = scalar_lea.vmem %s284_s17, 32 }
  0x5b   : > { %p4693_p2 = scmp.ne.s32.totalorder %s284_s17, %s4692_s18  ;;  %p4700_p9 = scmp.lt.s32.totalorder %s284_s17, %s284_s17 }
  0x5c   : > { %p4701_p11 = scmp.lt.s32.totalorder %s4699_s13, %s4692_s18 }
  0x5d   : > { %p4695_p3 = pnand %p4693_p2, %p4902_p10 }
  0x5e   : > { %p4702_p1 = por %p4701_p11, %p4700_p9 }
  0x5f   : > { %p4696_p7 = pneg %p4695_p3 }
  0x61   : > { %p4703_p4 = pnand %p4702_p1, %p4696_p7 }
  0x63   : > { %4706 = shalt.err (!%p4703_p4)
}
  0x64   : > { %4115 = dma.hbm_to_vmem [thread:$0]  (!%p4886_p8), %s5434_s7, 16, %s284_s17, [#allocation9]  }
  0x65   : > { %s4987_s24 = sadd.s32 1, %s4779_s30   ;;  %s56_s19 = sadd.s32 1, %s4775_s29 }
  0x66   : > { %s53_s20 = ssub.s32 %s4779_s30, %s4987_s24  ;;  %p63_p10 = scmp.ne.s32.totalorder %s4775_s29, %s4771_s28 }
  0x67   : > { %p54_p5 = scmp.eq.s32.totalorder %s53_s20, 0  ;;  %p64_p6 = scmp.eq.s32.totalorder %s4779_s30, 0 }
  0x68   : > { %p4124_p12 = scmp.lt.s32.totalorder %s4779_s30, 4  ;;  %s302_s14 = sand.u32 1, %s4775_s29  }
  0x69   : > { %s4998_s21 = scalar_select %p54_p5, %s4775_s29, %s56_s19  }
  0x6a   : > { %p65_p13 = por %p64_p6, %p63_p10  ;;  %s3638_s22 = sshll.u32 %s302_s14, 10 }
  0x6b   : > { %s3912_s23 = sshll.u32 %s4779_s30, 14  ;;  %s306_s17 = scalar_lea.vmem [#allocation3], %s3638_s22 }
  0x6c   : > { %s5004_s18 = scalar_lea.hbm %s5428_s1, %s3912_s23  ;;  %s314_s13 = sshll.u32 %s306_s17, 4  ;;  %s5010_s13 = int_to_ptr.vmem [resolvable:$true] %s314_s13 }
  0x6d   : > { %p5006_p8 = pnand %p4124_p12, %p65_p13  ;;  %s5012_s30 = scalar_lea.sflag [#allocation4], %s302_s14 }
  0x6e   : > { %s4707_s15 = scalar_lea.hbm %s5004_s18, 16384  ;;  %s4712_s22 = scalar_lea.hbm %s5428_s1, 65536 }
  0x6f   : > { %p4708_p0 = scmp.ne.s32.totalorder %s5004_s18, %s4707_s15  ;;  %p4709_p2 = pneg %p5006_p8 }
  0x70   : > { %p4713_p9 = scmp.lt.u32.totalorder %s5004_s18, %s5428_s1  ;;  %p4714_p11 = scmp.lt.u32.totalorder %s4712_s22, %s4707_s15 }
  0x71   : > { %p4710_p3 = pnand %p4709_p2, %p4708_p0  ;;  %p4716_p4 = scmp.lt.u32.totalorder %s4707_s15, %s5004_s18 }
  0x72   : > { %p4715_p1 = por %p4714_p11, %p4713_p9 }
  0x73   : > { %p4711_p7 = pneg %p4710_p3 }
  0x74   : > { %p4717_p10 = por %p4716_p4, %p4715_p1 }
  0x76   : > { %p4718_p5 = pnand %p4717_p10, %p4711_p7 }
  0x78   : > { %4721 = shalt.err (!%p4718_p5)
}
  0x79   : > { %s4722_s14 = scalar_lea.vmem %s5010_s13, 16384  ;;  %s4789_s26 = smov [#allocation3]  }
  0x7a   : > { %p4723_p6 = scmp.ne.s32.totalorder %s5010_s13, %s4722_s14  ;;  %s4727_s17 = sshll.u32 %s4789_s26, 4  ;;  %s4728_s17 = int_to_ptr.vmem [resolvable:$false] %s4727_s17 }
  0x7b   : > { %s4729_s19 = scalar_lea.vmem %s4728_s17, 32768  ;;  %p4730_p0 = scmp.lt.s32.totalorder %s5010_s13, %s4728_s17 }
  0x7c   : > { %p4725_p12 = pnand %p4723_p6, %p4709_p2  ;;  %p4731_p3 = scmp.lt.s32.totalorder %s4729_s19, %s4722_s14 }
  0x7e   : > { %p4726_p13 = pneg %p4725_p12  ;;  %p4732_p9 = por %p4731_p3, %p4730_p0 }
  0x80   : > { %p4733_p11 = pnand %p4732_p9, %p4726_p13 }
  0x82   : > { %4736 = shalt.err (!%p4733_p11)
}
  0x83   : > { %4119 = dma.hbm_to_vmem [thread:$0]  (!%p5006_p8), %s5004_s18, 16384, %s5010_s13, %s5012_s30, %s4786_s16, %s4786_s16, %s4787_s27  }
  0x84   : > { %p5444_p2 = scmp.ne.s32.totalorder %s5440_s11, 0 }
  0x85   : > { %s328_s15 = sand.u32 (!%p5444_p2), 1, %s4771_s28   ;;  %p5445_p7 = scmp.ne.s32.totalorder (!%p5444_p2), %s5439_s10, 0 }
  0x86   : > { %326 = sbr.rel (%p5444_p2) target bundleno = 2605 (0xa2d), region = 52  ;;  %s3643_s20 = sshll.u32 (!%p5444_p2), %s328_s15, 10 }
  0x87   : > { %s329_s22 = scalar_lea.sflag (!%p5444_p2), [#allocation4], %s328_s15  ;;  %s5046_s23 = scalar_lea.vmem (!%p5444_p2), [#allocation3], %s3643_s20 }
  0x8d   : > { %4754 = dma.done.wait (%p5445_p7), %s329_s22, 16384  }
  0x8e   : > { %4756 = vsyncadd (%p5445_p7), %s329_s22, 4294950912  ;;  %p5446_p1 = scmp.eq.s32.totalorder %s4863_s9, 0 }
  0x90   : > { %4758 = dma.done.wait (%p5446_p1), [#allocation6], 16384   ;;  %p5447_p8 = pmov %p5446_p1 }
  0x91   : > { %p5448_p4 = pmov %p5446_p1 }
  0x92   : > { %4760 = vsyncadd (%p5447_p8), [#allocation6], 4294950912 }
  0x93   : > { %4762 = dma.done.wait (%p5448_p4), [#allocation9], 528   ;;  %p5449_p10 = pmov %p5446_p1 }
  0x94   : > { %s3648_s11 = sshll.u32 %s4863_s9, 2  ;;  %p5450_p6 = scmp.ne.s32.totalorder %s4863_s9, 0 }
  0x95   : > { %4764 = vsyncadd (%p5449_p10), [#allocation9], 4294966768  ;;  %p381_p5 = scmp.lt.s32.totalorder %s3648_s11, 15  ;;  %v4790_v0 = vmov (!%p5450_p6), 0.0  }
  0x96   : > { %390 = sbr.rel (%p5450_p6) target bundleno = 157 (0x9d), region = 76  ;;  %391 = vst [vmem:[#allocation2] sm:$0xff] (!%p5450_p6), %v4790_v0 }
  0x97   : > { %s5456_s11 = smov (!%p381_p5, %s3648_s11), 15 }
  0x98   : > { %s383_s27 = scalar_lea.vmem %s5427_s0, %s5456_s11 }
  0x9d PF: > { %v4178_v1 = vld [vmem:[%s5046_s23 + $0x4] ss:$16 sps:$4 sm:$0xff]   ;;  %v4180_v2 = vld [vmem:[%s5046_s23 + $0xc] ss:$16 sps:$4 sm:$0xff]   ;;  %v4182_v3 = vld [vmem:[%s5046_s23] ss:$16 sps:$4 sm:$0xff]   ;;  %v534_v41 = vlaneseq }
  0x9e   : > { %1191 = vmatprep.subr.bf16.mxu0 %v4178_v1  ;;  %v4183_v4 = vld [vmem:[%s5046_s23 + $0x8] ss:$16 sps:$4 sm:$0xff]   ;;  %1273 = vmatprep.subr.bf16.mxu1 %v4180_v2  ;;  %v4184_v5 = vld [vmem:[%s5046_s23 + $0x24] ss:$16 sps:$4 sm:$0xff]   ;;  %v4186_v6 = vld [vmem:[%s5046_s23 + $0x2c] ss:$16 sps:$4 sm:$0xff]  }
  0x9f   : > { %1192 = vmatpush1.bf16.msra.mxu0 %v4182_v3  ;;  %1274 = vmatpush1.bf16.msra.mxu1 %v4183_v4  ;;  %v4188_v7 = vld [vmem:[%s5046_s23 + $0x20] ss:$16 sps:$4 sm:$0xff]   ;;  %v4189_v8 = vld [vmem:[%s5046_s23 + $0x28] ss:$16 sps:$4 sm:$0xff]   ;;  %v4190_v9 = vld [vmem:[%s5046_s23 + $0x44] ss:$16 sps:$4 sm:$0xff]  }
  0xa0   : > { %1193 = vmatprep.subr.bf16.mxu0 %v4184_v5  ;;  %1275 = vmatprep.subr.bf16.mxu1 %v4186_v6  ;;  %v4192_v10 = vld [vmem:[%s5046_s23 + $0x4c] ss:$16 sps:$4 sm:$0xff]   ;;  %v4194_v11 = vld [vmem:[%s5046_s23 + $0x40] ss:$16 sps:$4 sm:$0xff]   ;;  %v4195_v12 = vld [vmem:[%s5046_s23 + $0x48] ss:$16 sps:$4 sm:$0xff]  }
  0xa1   : > { %v4196_v13 = vld [vmem:[%s5046_s23 + $0x64] ss:$16 sps:$4 sm:$0xff]   ;;  %v4198_v14 = vld [vmem:[%s5046_s23 + $0x6c] ss:$16 sps:$4 sm:$0xff]   ;;  %v4200_v15 = vld [vmem:[%s5046_s23 + $0x60] ss:$16 sps:$4 sm:$0xff]  }
  0xa2   : > { %v4201_v16 = vld [vmem:[%s5046_s23 + $0x68] ss:$16 sps:$4 sm:$0xff]   ;;  %v4202_v17 = vld [vmem:[%s5046_s23 + $0x84] ss:$16 sps:$4 sm:$0xff]   ;;  %v4204_v18 = vld [vmem:[%s5046_s23 + $0x8c] ss:$16 sps:$4 sm:$0xff]  }
  0xa3   : > { %1194 = vmatpush1.bf16.msra.mxu0 %v4188_v7  ;;  %1276 = vmatpush1.bf16.msra.mxu1 %v4189_v8  ;;  %v4206_v19 = vld [vmem:[%s5046_s23 + $0x80] ss:$16 sps:$4 sm:$0xff]   ;;  %v4207_v20 = vld [vmem:[%s5046_s23 + $0x88] ss:$16 sps:$4 sm:$0xff]   ;;  %v4208_v21 = vld [vmem:[%s5046_s23 + $0xa4] ss:$16 sps:$4 sm:$0xff]  }
  0xa4   : > { %1195 = vmatprep.subr.bf16.mxu0 %v4190_v9  ;;  %1277 = vmatprep.subr.bf16.mxu1 %v4192_v10  ;;  %v4210_v22 = vld [vmem:[%s5046_s23 + $0xac] ss:$16 sps:$4 sm:$0xff]   ;;  %v4212_v23 = vld [vmem:[%s5046_s23 + $0xa0] ss:$16 sps:$4 sm:$0xff]   ;;  %v4213_v24 = vld [vmem:[%s5046_s23 + $0xa8] ss:$16 sps:$4 sm:$0xff]  }
  0xa5   : > { %v4214_v25 = vld [vmem:[%s5046_s23 + $0xc4] ss:$16 sps:$4 sm:$0xff]   ;;  %v4216_v26 = vld [vmem:[%s5046_s23 + $0xcc] ss:$16 sps:$4 sm:$0xff]   ;;  %v4218_v27 = vld [vmem:[%s5046_s23 + $0xc0] ss:$16 sps:$4 sm:$0xff]  }
  0xa6   : > { %v4219_v28 = vld [vmem:[%s5046_s23 + $0xc8] ss:$16 sps:$4 sm:$0xff]   ;;  %v4220_v29 = vld [vmem:[%s5046_s23 + $0xe4] ss:$16 sps:$4 sm:$0xff]   ;;  %v4222_v30 = vld [vmem:[%s5046_s23 + $0xec] ss:$16 sps:$4 sm:$0xff]  }
  0xa7   : > { %1196 = vmatpush1.bf16.msra.mxu0 %v4194_v11  ;;  %1278 = vmatpush1.bf16.msra.mxu1 %v4195_v12  ;;  %v4224_v31 = vld [vmem:[%s5046_s23 + $0xe0] ss:$16 sps:$4 sm:$0xff]   ;;  %v4225_v32 = vld [vmem:[%s5046_s23 + $0xe8] ss:$16 sps:$4 sm:$0xff]   ;;  %v4226_v33 = vld [vmem:[%s5046_s23 + $0x104] ss:$16 sps:$4 sm:$0xff]  }
  0xa8   : > { %1197 = vmatprep.subr.bf16.mxu0 %v4196_v13  ;;  %1279 = vmatprep.subr.bf16.mxu1 %v4198_v14  ;;  %v4228_v34 = vld [vmem:[%s5046_s23 + $0x10c] ss:$16 sps:$4 sm:$0xff]   ;;  %v4230_v35 = vld [vmem:[%s5046_s23 + $0x100] ss:$16 sps:$4 sm:$0xff]   ;;  %v4231_v36 = vld [vmem:[%s5046_s23 + $0x108] ss:$16 sps:$4 sm:$0xff]  }
  0xa9   : > { %v4232_v37 = vld [vmem:[%s5046_s23 + $0x124] ss:$16 sps:$4 sm:$0xff]   ;;  %v4234_v38 = vld [vmem:[%s5046_s23 + $0x12c] ss:$16 sps:$4 sm:$0xff]   ;;  %v4791_v39 = vmov 1966171168  }
  0xaa   : > { %v532_v40 = vunpack.c.l.s4 %v4791_v39  ;;  %v4236_v42 = vld [vmem:[%s5046_s23 + $0x120] ss:$16 sps:$4 sm:$0xff]   ;;  %v4237_v43 = vld [vmem:[%s5046_s23 + $0x128] ss:$16 sps:$4 sm:$0xff]   ;;  %v4238_v44 = vld [vmem:[%s5046_s23 + $0x144] ss:$16 sps:$4 sm:$0xff]  }
  0xab   : > { %1198 = vmatpush1.bf16.msra.mxu0 %v4200_v15  ;;  %1280 = vmatpush1.bf16.msra.mxu1 %v4201_v16  ;;  %v4240_v45 = vld [vmem:[%s5046_s23 + $0x14c] ss:$16 sps:$4 sm:$0xff]   ;;  %v5112_v47 = vshrl.u32 %v534_v41, 7  ;;  %v4242_v48 = vld [vmem:[%s5046_s23 + $0x140] ss:$16 sps:$4 sm:$0xff]   ;;  %p3779_p12 = scmp.ne.s32.totalorder %s4863_s9, 3 }
  0xac   : > { %1199 = vmatprep.subr.bf16.mxu0 %v4202_v17  ;;  %1281 = vmatprep.subr.bf16.mxu1 %v4204_v18  ;;  %v533_v46 = vunpack.c.0.s8 %v532_v40  ;;  %v4243_v49 = vld [vmem:[%s5046_s23 + $0x148] ss:$16 sps:$4 sm:$0xff]   ;;  %v4244_v50 = vld [vmem:[%s5046_s23 + $0x164] ss:$16 sps:$4 sm:$0xff]   ;;  %v4246_v51 = vld [vmem:[%s5046_s23 + $0x16c] ss:$16 sps:$4 sm:$0xff]  }
  0xad   : > { %v3650_v53 = vld.sshfl [vmem:[%s383_s27] sm:$0x33 pattern:$0x75316420]  ;;  %v4248_v54 = vld [vmem:[%s5046_s23 + $0x160] ss:$16 sps:$4 sm:$0xff]  }
  0xae   : > { %v536_v52 = vsub.s32 %v533_v46, %v5112_v47  ;;  %v4249_v55 = vld [vmem:[%s5046_s23 + $0x168] ss:$16 sps:$4 sm:$0xff]   ;;  %v530_v56 = vcombine.high %v3650_v53, %v3650_v53  ;;  %v4250_v57 = vld [vmem:[%s5046_s23 + $0x184] ss:$16 sps:$4 sm:$0xff]   ;;  %v4252_v58 = vld [vmem:[%s5046_s23 + $0x18c] ss:$16 sps:$4 sm:$0xff]  }
  0xaf   : > { %1200 = vmatpush1.bf16.msra.mxu0 %v4206_v19  ;;  %1282 = vmatpush1.bf16.msra.mxu1 %v4207_v20  ;;  %v4254_v60 = vld [vmem:[%s5046_s23 + $0x180] ss:$16 sps:$4 sm:$0xff]   ;;  %v4255_v61 = vld [vmem:[%s5046_s23 + $0x188] ss:$16 sps:$4 sm:$0xff]   ;;  %v4256_v62 = vld [vmem:[%s5046_s23 + $0x1a4] ss:$16 sps:$4 sm:$0xff]  }
  0xb0   : > { %1201 = vmatprep.subr.bf16.mxu0 %v4208_v21  ;;  %1283 = vmatprep.subr.bf16.mxu1 %v4210_v22  ;;  %v544_v59 = vrot.slane %v530_v56, %v536_v52  ;;  %v4258_v63 = vld [vmem:[%s5046_s23 + $0x1ac] ss:$16 sps:$4 sm:$0xff]   ;;  %v4260_v0 = vld [vmem:[%s5046_s23 + $0x1a0] ss:$16 sps:$4 sm:$0xff]   ;;  %v4261_v1 = vld [vmem:[%s5046_s23 + $0x1a8] ss:$16 sps:$4 sm:$0xff]   ;;  %v5145_v13 = vrot.slane %v3650_v53, %v536_v52 }
  0xb1   : > { %v4262_v2 = vld [vmem:[%s5046_s23 + $0x1c4] ss:$16 sps:$4 sm:$0xff]   ;;  %v4264_v3 = vld [vmem:[%s5046_s23 + $0x1cc] ss:$16 sps:$4 sm:$0xff]   ;;  %v4266_v4 = vld [vmem:[%s5046_s23 + $0x1c0] ss:$16 sps:$4 sm:$0xff]  }
  0xb2   : > { %1223 = vmatprep.mubr.bf16.mxu0 %v544_v59  ;;  %1305 = vmatprep.mubr.bf16.mxu1 %v544_v59  ;;  %v4267_v5 = vld [vmem:[%s5046_s23 + $0x1c8] ss:$16 sps:$4 sm:$0xff]   ;;  %v4268_v6 = vld [vmem:[%s5046_s23 + $0x1e4] ss:$16 sps:$4 sm:$0xff]   ;;  %v4270_v7 = vld [vmem:[%s5046_s23 + $0x1ec] ss:$16 sps:$4 sm:$0xff]   ;;  %v546_v17 = vcombine.high %v544_v59, %v544_v59 }
  0xb3   : > { %1202 = vmatpush1.bf16.msra.mxu0 %v4212_v23  ;;  %1284 = vmatpush1.bf16.msra.mxu1 %v4213_v24  ;;  %v4272_v8 = vld [vmem:[%s5046_s23 + $0x1e0] ss:$16 sps:$4 sm:$0xff]   ;;  %v4273_v9 = vld [vmem:[%s5046_s23 + $0x1e8] ss:$16 sps:$4 sm:$0xff]   ;;  %v4276_v10 = vld [vmem:[%s5046_s23 + $0x204] ss:$16 sps:$4 sm:$0xff]  }
  0xb4   : > { %1203 = vmatprep.subr.bf16.mxu0 %v4214_v25  ;;  %1285 = vmatprep.subr.bf16.mxu1 %v4216_v26  ;;  %v4279_v11 = vld [vmem:[%s5046_s23 + $0x20c] ss:$16 sps:$4 sm:$0xff]   ;;  %v4274_v12 = vld [vmem:[%s5046_s23 + $0x200] ss:$16 sps:$4 sm:$0xff]   ;;  %v4277_v14 = vld [vmem:[%s5046_s23 + $0x208] ss:$16 sps:$4 sm:$0xff]  }
  0xb5   : > { %v4282_v15 = vld [vmem:[%s5046_s23 + $0x224] ss:$16 sps:$4 sm:$0xff]   ;;  %v4285_v16 = vld [vmem:[%s5046_s23 + $0x22c] ss:$16 sps:$4 sm:$0xff]   ;;  %v4280_v18 = vld [vmem:[%s5046_s23 + $0x220] ss:$16 sps:$4 sm:$0xff]  }
  0xb6   : > { %v4283_v19 = vld [vmem:[%s5046_s23 + $0x228] ss:$16 sps:$4 sm:$0xff]   ;;  %v4288_v20 = vld [vmem:[%s5046_s23 + $0x244] ss:$16 sps:$4 sm:$0xff]   ;;  %v4291_v21 = vld [vmem:[%s5046_s23 + $0x24c] ss:$16 sps:$4 sm:$0xff]  }
  0xb7   : > { %1204 = vmatpush1.bf16.msra.mxu0 %v4218_v27  ;;  %1286 = vmatpush1.bf16.msra.mxu1 %v4219_v28  ;;  %v4286_v22 = vld [vmem:[%s5046_s23 + $0x240] ss:$16 sps:$4 sm:$0xff]   ;;  %v4289_v23 = vld [vmem:[%s5046_s23 + $0x248] ss:$16 sps:$4 sm:$0xff]   ;;  %v4294_v24 = vld [vmem:[%s5046_s23 + $0x264] ss:$16 sps:$4 sm:$0xff]  }
  0xb8   : > { %1205 = vmatprep.subr.bf16.mxu0 %v4220_v29  ;;  %1287 = vmatprep.subr.bf16.mxu1 %v4222_v30  ;;  %v4297_v25 = vld [vmem:[%s5046_s23 + $0x26c] ss:$16 sps:$4 sm:$0xff]   ;;  %v4292_v26 = vld [vmem:[%s5046_s23 + $0x260] ss:$16 sps:$4 sm:$0xff]   ;;  %v4295_v27 = vld [vmem:[%s5046_s23 + $0x268] ss:$16 sps:$4 sm:$0xff]  }
  0xb9   : > { %v4300_v28 = vld [vmem:[%s5046_s23 + $0x284] ss:$16 sps:$4 sm:$0xff]   ;;  %v4303_v29 = vld [vmem:[%s5046_s23 + $0x28c] ss:$16 sps:$4 sm:$0xff]   ;;  %v4298_v30 = vld [vmem:[%s5046_s23 + $0x280] ss:$16 sps:$4 sm:$0xff]  }
  0xba   : > { %v4313_v39 = vld [vmem:[%s5046_s23 + $0x2c8] ss:$16 sps:$4 sm:$0xff]   ;;  %v4318_v40 = vld [vmem:[%s5046_s23 + $0x2e4] ss:$16 sps:$4 sm:$0xff]   ;;  %v4327_v46 = vld [vmem:[%s5046_s23 + $0x30c] ss:$16 sps:$4 sm:$0xff]  }
  0xbb   : > { %1206 = vmatpush1.bf16.msra.mxu0 %v4224_v31  ;;  %1288 = vmatpush1.bf16.msra.mxu1 %v4225_v32  ;;  %v4301_v31 = vld [vmem:[%s5046_s23 + $0x288] ss:$16 sps:$4 sm:$0xff]   ;;  %v4306_v32 = vld [vmem:[%s5046_s23 + $0x2a4] ss:$16 sps:$4 sm:$0xff]   ;;  %v4328_v52 = vld [vmem:[%s5046_s23 + $0x320] ss:$16 sps:$4 sm:$0xff]  }
  0xbc   : > { %1207 = vmatprep.subr.bf16.mxu0 %v4226_v33  ;;  %1289 = vmatprep.subr.bf16.mxu1 %v4228_v34  ;;  %v4309_v33 = vld [vmem:[%s5046_s23 + $0x2ac] ss:$16 sps:$4 sm:$0xff]   ;;  %v4304_v34 = vld [vmem:[%s5046_s23 + $0x2a0] ss:$16 sps:$4 sm:$0xff]   ;;  %v4331_v53 = vld [vmem:[%s5046_s23 + $0x328] ss:$16 sps:$4 sm:$0xff]  }
  0xbd   : > { %v4334_v56 = vld [vmem:[%s5046_s23 + $0x340] ss:$16 sps:$4 sm:$0xff]   ;;  %v4345_v59 = vld [vmem:[%s5046_s23 + $0x36c] ss:$16 sps:$4 sm:$0xff]   ;;  %vm4794_vm0 = vmmov (!%p3779_p12), 0   ;;  %vm2359_vm1 = vcmask (!%p3779_p12), 1041408  }
  0xbe   : > { %vm2534_vm4 = vcmask (!%p3779_p12), 9216  }
  0xbf   : > { %1208 = vmatpush1.bf16.msra.mxu0 %v4230_v35  ;;  %1290 = vmatpush1.bf16.msra.mxu1 %v4231_v36  ;;  %v4307_v35 = vld [vmem:[%s5046_s23 + $0x2a8] ss:$16 sps:$4 sm:$0xff]   ;;  %v4312_v36 = vld [vmem:[%s5046_s23 + $0x2c4] ss:$16 sps:$4 sm:$0xff]  }
  0xc0   : > { %1209 = vmatprep.subr.bf16.mxu0 %v4232_v37  ;;  %1291 = vmatprep.subr.bf16.mxu1 %v4234_v38  ;;  %v4315_v37 = vld [vmem:[%s5046_s23 + $0x2cc] ss:$16 sps:$4 sm:$0xff]   ;;  %v4310_v38 = vld [vmem:[%s5046_s23 + $0x2c0] ss:$16 sps:$4 sm:$0xff]  }
  0xc3   : > { %1210 = vmatpush1.bf16.msra.mxu0 %v4236_v42  ;;  %1292 = vmatpush1.bf16.msra.mxu1 %v4237_v43  ;;  %v4321_v42 = vld [vmem:[%s5046_s23 + $0x2ec] ss:$16 sps:$4 sm:$0xff]   ;;  %v4316_v43 = vld [vmem:[%s5046_s23 + $0x2e0] ss:$16 sps:$4 sm:$0xff]  }
  0xc4   : > { %1211 = vmatprep.subr.bf16.mxu0 %v4238_v44  ;;  %1293 = vmatprep.subr.bf16.mxu1 %v4240_v45  ;;  %v4319_v44 = vld [vmem:[%s5046_s23 + $0x2e8] ss:$16 sps:$4 sm:$0xff]   ;;  %v4324_v45 = vld [vmem:[%s5046_s23 + $0x304] ss:$16 sps:$4 sm:$0xff]  }
  0xc7   : > { %1212 = vmatpush1.bf16.msra.mxu0 %v4242_v48  ;;  %1294 = vmatpush1.bf16.msra.mxu1 %v4243_v49  ;;  %v4322_v48 = vld [vmem:[%s5046_s23 + $0x300] ss:$16 sps:$4 sm:$0xff]   ;;  %v4325_v49 = vld [vmem:[%s5046_s23 + $0x308] ss:$16 sps:$4 sm:$0xff]  }
  0xc8   : > { %1213 = vmatprep.subr.bf16.mxu0 %v4244_v50  ;;  %1295 = vmatprep.subr.bf16.mxu1 %v4246_v51  ;;  %v4330_v50 = vld [vmem:[%s5046_s23 + $0x324] ss:$16 sps:$4 sm:$0xff]   ;;  %v4333_v51 = vld [vmem:[%s5046_s23 + $0x32c] ss:$16 sps:$4 sm:$0xff]  }
  0xcb   : > { %1214 = vmatpush1.bf16.msra.mxu0 %v4248_v54  ;;  %1296 = vmatpush1.bf16.msra.mxu1 %v4249_v55  ;;  %v4336_v54 = vld [vmem:[%s5046_s23 + $0x344] ss:$16 sps:$4 sm:$0xff]   ;;  %v4339_v55 = vld [vmem:[%s5046_s23 + $0x34c] ss:$16 sps:$4 sm:$0xff]  }
  0xcc   : > { %1215 = vmatprep.subr.bf16.mxu0 %v4250_v57  ;;  %1297 = vmatprep.subr.bf16.mxu1 %v4252_v58  ;;  %v4337_v57 = vld [vmem:[%s5046_s23 + $0x348] ss:$16 sps:$4 sm:$0xff]   ;;  %v4342_v58 = vld [vmem:[%s5046_s23 + $0x364] ss:$16 sps:$4 sm:$0xff]  }
  0xcf   : > { %1216 = vmatpush1.bf16.msra.mxu0 %v4254_v60  ;;  %1298 = vmatpush1.bf16.msra.mxu1 %v4255_v61  ;;  %v4340_v60 = vld [vmem:[%s5046_s23 + $0x360] ss:$16 sps:$4 sm:$0xff]   ;;  %v4343_v61 = vld [vmem:[%s5046_s23 + $0x368] ss:$16 sps:$4 sm:$0xff]  }
  0xd0   : > { %1217 = vmatprep.subr.bf16.mxu0 %v4256_v62  ;;  %1299 = vmatprep.subr.bf16.mxu1 %v4258_v63  ;;  %v4348_v62 = vld [vmem:[%s5046_s23 + $0x384] ss:$16 sps:$4 sm:$0xff]   ;;  %v4351_v63 = vld [vmem:[%s5046_s23 + $0x38c] ss:$16 sps:$4 sm:$0xff]  }
  0xd3   : > { %1218 = vmatpush1.bf16.msra.mxu0 %v4260_v0  ;;  %1300 = vmatpush1.bf16.msra.mxu1 %v4261_v1  ;;  %v4346_v0 = vld [vmem:[%s5046_s23 + $0x380] ss:$16 sps:$4 sm:$0xff]   ;;  %v4349_v1 = vld [vmem:[%s5046_s23 + $0x388] ss:$16 sps:$4 sm:$0xff]  }
  0xd4   : > { %1219 = vmatprep.subr.bf16.mxu0 %v4262_v2  ;;  %1301 = vmatprep.subr.bf16.mxu1 %v4264_v3  ;;  %v4354_v2 = vld [vmem:[%s5046_s23 + $0x3a4] ss:$16 sps:$4 sm:$0xff]   ;;  %v4357_v3 = vld [vmem:[%s5046_s23 + $0x3ac] ss:$16 sps:$4 sm:$0xff]  }
  0xd7   : > { %1220 = vmatpush1.bf16.msra.mxu0 %v4266_v4  ;;  %1302 = vmatpush1.bf16.msra.mxu1 %v4267_v5  ;;  %v4352_v4 = vld [vmem:[%s5046_s23 + $0x3a0] ss:$16 sps:$4 sm:$0xff]   ;;  %v4355_v5 = vld [vmem:[%s5046_s23 + $0x3a8] ss:$16 sps:$4 sm:$0xff]  }
  0xd8   : > { %1221 = vmatprep.subr.bf16.mxu0 %v4268_v6  ;;  %1303 = vmatprep.subr.bf16.mxu1 %v4270_v7  ;;  %v4360_v6 = vld [vmem:[%s5046_s23 + $0x3c4] ss:$16 sps:$4 sm:$0xff]   ;;  %v4363_v7 = vld [vmem:[%s5046_s23 + $0x3cc] ss:$16 sps:$4 sm:$0xff]  }
  0xdb   : > { %1222 = vmatpush1.bf16.msra.mxu0 %v4272_v8  ;;  %1304 = vmatpush1.bf16.msra.mxu1 %v4273_v9  ;;  %v4358_v8 = vld [vmem:[%s5046_s23 + $0x3c0] ss:$16 sps:$4 sm:$0xff]   ;;  %v4361_v9 = vld [vmem:[%s5046_s23 + $0x3c8] ss:$16 sps:$4 sm:$0xff]  }
  0xdc   : > { %1232 = vmatprep.subr.bf16.mxu0 %v4276_v10  ;;  %1314 = vmatprep.subr.bf16.mxu1 %v4279_v11  ;;  %v4366_v10 = vld [vmem:[%s5046_s23 + $0x3e4] ss:$16 sps:$4 sm:$0xff]   ;;  %v4369_v11 = vld [vmem:[%s5046_s23 + $0x3ec] ss:$16 sps:$4 sm:$0xff]  }
  0xde   : > { %1224 = vmatmul.mubr.bf16.vlgmr.msra.gmra.mrb[0].mxu0 %v5145_v13  ;;  %1306 = vmatmul.mubr.bf16.vlgmr.msra.gmra.mrb[0].mxu1 %v5145_v13 }
  0xdf   : > { %1233 = vmatpush1.bf16.msra.mxu0 %v4274_v12  ;;  %1315 = vmatpush1.bf16.msra.mxu1 %v4277_v14  ;;  %v4364_v12 = vld [vmem:[%s5046_s23 + $0x3e0] ss:$16 sps:$4 sm:$0xff]   ;;  %v4367_v14 = vld [vmem:[%s5046_s23 + $0x3e8] ss:$16 sps:$4 sm:$0xff]  }
  0xe0   : > { %1234 = vmatprep.subr.bf16.mxu0 %v4282_v15  ;;  %1316 = vmatprep.subr.bf16.mxu1 %v4285_v16  ;;  %v545_v15 = vcombine.high %v5145_v13, %v5145_v13  ;;  %v4792_v16 = vmov 1983009808  }
  0xe1   : > { %1264 = vmatprep.mubr.bf16.mxu0 %v546_v17  ;;  %1346 = vmatprep.mubr.bf16.mxu1 %v546_v17  ;;  %v1362_v17 = vunpack.c.l.s4 %v4792_v16  ;;  %v4410_v16 = vld [vmem:[#allocation5 + $0xb0] ss:$8 sps:$4 sm:$0xff] (!%p3779_p12)  }
  0xe3   : > { %1235 = vmatpush1.bf16.msra.mxu0 %v4280_v18  ;;  %1317 = vmatpush1.bf16.msra.mxu1 %v4283_v19  ;;  %v1363_v18 = vunpack.c.0.s8 %v1362_v17  ;;  %v4411_v17 = vld [vmem:[#allocation5 + $0xc4] ss:$8 sps:$4 sm:$0xff] (!%p3779_p12)  }
  0xe4   : > { %1236 = vmatprep.subr.bf16.mxu0 %v4288_v20  ;;  %1318 = vmatprep.subr.bf16.mxu1 %v4291_v21 }
  0xe5   : > { %v5213_v21 = vsub.s32 %v1363_v18, %v5112_v47  ;;  %v4471_v18 = vld [vmem:[#allocation7 + $0x104] ss:$16 sps:$4 sm:$0xff] (!%p3779_p12)  }
  0xe7   : > { %1237 = vmatpush1.bf16.msra.mxu0 %v4286_v22  ;;  %1319 = vmatpush1.bf16.msra.mxu1 %v4289_v23 }
  0xe8   : > { %1238 = vmatprep.subr.bf16.mxu0 %v4294_v24  ;;  %1320 = vmatprep.subr.bf16.mxu1 %v4297_v25 }
  0xeb   : > { %1239 = vmatpush1.bf16.msra.mxu0 %v4292_v26  ;;  %1321 = vmatpush1.bf16.msra.mxu1 %v4295_v27 }
  0xec   : > { %1240 = vmatprep.subr.bf16.mxu0 %v4300_v28  ;;  %1322 = vmatprep.subr.bf16.mxu1 %v4303_v29 }
  0xef   : > { %1241 = vmatpush1.bf16.msra.mxu0 %v4298_v30  ;;  %1323 = vmatpush1.bf16.msra.mxu1 %v4301_v31  ;;  %v392_v31 = vld [vmem:[#allocation2] sm:$0xff] }
  0xf0   : > { %1242 = vmatprep.subr.bf16.mxu0 %v4306_v32  ;;  %1324 = vmatprep.subr.bf16.mxu1 %v4309_v33 }
  0xf3   : > { %1243 = vmatpush1.bf16.msra.mxu0 %v4304_v34  ;;  %1325 = vmatpush1.bf16.msra.mxu1 %v4307_v35  ;;  %v4375_v34 = vld [vmem:[#allocation5 + $0x4] ss:$8 sps:$4 sm:$0xff] (!%p3779_p12)   ;;  %v4377_v35 = vld [vmem:[#allocation5] ss:$8 sps:$4 sm:$0xff] (!%p3779_p12)  }
  0xf4   : > { %1244 = vmatprep.subr.bf16.mxu0 %v4312_v36  ;;  %1326 = vmatprep.subr.bf16.mxu1 %v4315_v37  ;;  %v4378_v36 = vld [vmem:[#allocation5 + $0x14] ss:$8 sps:$4 sm:$0xff] (!%p3779_p12)   ;;  %v4380_v37 = vld [vmem:[#allocation5 + $0x10] ss:$8 sps:$4 sm:$0xff] (!%p3779_p12)  }
  0xf7   : > { %1245 = vmatpush1.bf16.msra.mxu0 %v4310_v38  ;;  %1327 = vmatpush1.bf16.msra.mxu1 %v4313_v39  ;;  %v4793_v38 = vmov (!%p3779_p12), 0.0   ;;  %v4381_v39 = vld [vmem:[#allocation5 + $0x24] ss:$8 sps:$4 sm:$0xff] (!%p3779_p12)  }
  0xf8   : > { %1246 = vmatprep.subr.bf16.mxu0 %v4318_v40  ;;  %1328 = vmatprep.subr.bf16.mxu1 %v4321_v42  ;;  %v4383_v40 = vld [vmem:[#allocation5 + $0x20] ss:$8 sps:$4 sm:$0xff] (!%p3779_p12)   ;;  %v4384_v42 = vld [vmem:[#allocation5 + $0x34] ss:$8 sps:$4 sm:$0xff] (!%p3779_p12)  }
  0xfb   : > { %1247 = vmatpush1.bf16.msra.mxu0 %v4316_v43  ;;  %1329 = vmatpush1.bf16.msra.mxu1 %v4319_v44  ;;  %v4386_v43 = vld [vmem:[#allocation5 + $0x30] ss:$8 sps:$4 sm:$0xff] (!%p3779_p12)   ;;  %v4387_v44 = vld [vmem:[#allocation5 + $0x44] ss:$8 sps:$4 sm:$0xff] (!%p3779_p12)  }
  0xfc   : > { %1248 = vmatprep.subr.bf16.mxu0 %v4324_v45  ;;  %1330 = vmatprep.subr.bf16.mxu1 %v4327_v46  ;;  %v4389_v45 = vld [vmem:[#allocation5 + $0x40] ss:$8 sps:$4 sm:$0xff] (!%p3779_p12)   ;;  %v4390_v46 = vld [vmem:[#allocation5 + $0x54] ss:$8 sps:$4 sm:$0xff] (!%p3779_p12)  }
  0xff   : > { %1249 = vmatpush1.bf16.msra.mxu0 %v4322_v48  ;;  %1331 = vmatpush1.bf16.msra.mxu1 %v4325_v49  ;;  %v5220_v48 = vsub.s32 (!%p3779_p12), 0, %v5112_v47  ;;  %v5223_v49 = vsub.s32 (!%p3779_p12), 1, %v5112_v47 }
 0x100   : > { %1250 = vmatprep.subr.bf16.mxu0 %v4330_v50  ;;  %1332 = vmatprep.subr.bf16.mxu1 %v4333_v51  ;;  %v1396_v50 = vsub.s32 (!%p3779_p12), 2, %v5112_v47  ;;  %v1400_v51 = vsub.s32 (!%p3779_p12), 3, %v5112_v47 }
 0x103   : > { %1251 = vmatpush1.bf16.msra.mxu0 %v4328_v52  ;;  %1333 = vmatpush1.bf16.msra.mxu1 %v4331_v53  ;;  %v4392_v52 = vld [vmem:[#allocation5 + $0x50] ss:$8 sps:$4 sm:$0xff] (!%p3779_p12)   ;;  %v4393_v53 = vld [vmem:[#allocation5 + $0x64] ss:$8 sps:$4 sm:$0xff] (!%p3779_p12)  }
 0x104   : > { %1252 = vmatprep.subr.bf16.mxu0 %v4336_v54  ;;  %1334 = vmatprep.subr.bf16.mxu1 %v4339_v55  ;;  %v1384_v54 = vld [vmem:[#allocation8] ss:$8 sm:$0xf] (!%p3779_p12) }
 0x105   : > { %v1389_v55 = vrot.slane (!%p3779_p12), %v1384_v54, %v5220_v48 }
 0x107   : > { %1253 = vmatpush1.bf16.msra.mxu0 %v4334_v56  ;;  %1335 = vmatpush1.bf16.msra.mxu1 %v4337_v57  ;;  %v1393_v56 = vrot.slane (!%p3779_p12), %v1384_v54, %v5223_v49  ;;  %v1397_v57 = vrot.slane (!%p3779_p12), %v1384_v54, %v1396_v50  ;;  %v4440_v50 = vld [vmem:[#allocation5 + $0x154] ss:$8 sps:$4 sm:$0xff] (!%p3779_p12)  }
 0x108   : > { %1254 = vmatprep.subr.bf16.mxu0 %v4342_v58  ;;  %1336 = vmatprep.subr.bf16.mxu1 %v4345_v59  ;;  %v1401_v58 = vrot.slane (!%p3779_p12), %v1384_v54, %v1400_v51  ;;  %v4395_v59 = vld [vmem:[#allocation5 + $0x60] ss:$8 sps:$4 sm:$0xff] (!%p3779_p12)   ;;  %v4438_v51 = vld [vmem:[#allocation5 + $0x150] ss:$8 sps:$4 sm:$0xff] (!%p3779_p12)   ;;  %v4446_v54 = vld [vmem:[#allocation5 + $0x174] ss:$8 sps:$4 sm:$0xff] (!%p3779_p12)  }
 0x10b   : > { %1255 = vmatpush1.bf16.msra.mxu0 %v4340_v60  ;;  %1337 = vmatpush1.bf16.msra.mxu1 %v4343_v61  ;;  %v4396_v60 = vld [vmem:[#allocation5 + $0x74] ss:$8 sps:$4 sm:$0xff] (!%p3779_p12)   ;;  %v1402_v61 = vcombine.low (!%p3779_p12), %v1389_v55, %v1393_v56  ;;  %v4444_v55 = vld [vmem:[#allocation5 + $0x170] ss:$8 sps:$4 sm:$0xff] (!%p3779_p12)   ;;  %v4449_v56 = vld [vmem:[#allocation5 + $0x184] ss:$8 sps:$4 sm:$0xff] (!%p3779_p12)  }
 0x10c   : > { %1256 = vmatprep.subr.bf16.mxu0 %v4348_v62  ;;  %1338 = vmatprep.subr.bf16.mxu1 %v4351_v63  ;;  %v1403_v62 = vcombine.low (!%p3779_p12), %v1397_v57, %v1401_v58  ;;  %v4398_v63 = vld [vmem:[#allocation5 + $0x70] ss:$8 sps:$4 sm:$0xff] (!%p3779_p12)   ;;  %v4447_v57 = vld [vmem:[#allocation5 + $0x180] ss:$8 sps:$4 sm:$0xff] (!%p3779_p12)   ;;  %v4452_v58 = vld [vmem:[#allocation5 + $0x194] ss:$8 sps:$4 sm:$0xff] (!%p3779_p12)  }
 0x10d   : > { %v1410_v47 = vrot.slane (!%p3779_p12), %v1402_v61, %v5213_v21  ;;  %v4453_v61 = vld [vmem:[#allocation5 + $0x1a0] ss:$8 sps:$4 sm:$0xff] (!%p3779_p12)  }
 0x10f   : > { %1257 = vmatpush1.bf16.msra.mxu0 %v4346_v0  ;;  %1339 = vmatpush1.bf16.msra.mxu1 %v4349_v1  ;;  %v1417_v0 = vrot.slane (!%p3779_p12), %v1403_v62, %v5213_v21  ;;  %v4458_v62 = vld [vmem:[#allocation5 + $0x1b4] ss:$8 sps:$4 sm:$0xff] (!%p3779_p12)  }
 0x110   : > { %1258 = vmatprep.subr.bf16.mxu0 %v4354_v2  ;;  %1340 = vmatprep.subr.bf16.mxu1 %v4357_v3  ;;  %v4399_v2 = vld [vmem:[#allocation5 + $0x84] ss:$8 sps:$4 sm:$0xff] (!%p3779_p12)  }
 0x111   : > { %v1418_v3 = vcombine.low (!%p3779_p12), %v1410_v47, %v1417_v0  ;;  %v4461_v47 = vld [vmem:[#allocation5 + $0x1c4] ss:$8 sps:$4 sm:$0xff] (!%p3779_p12)   ;;  %v4459_v0 = vld [vmem:[#allocation5 + $0x1c0] ss:$8 sps:$4 sm:$0xff] (!%p3779_p12)  }
 0x113   : > { %1259 = vmatpush1.bf16.msra.mxu0 %v4352_v4  ;;  %1341 = vmatpush1.bf16.msra.mxu1 %v4355_v5  ;;  %v4401_v5 = vld [vmem:[#allocation5 + $0x80] ss:$8 sps:$4 sm:$0xff] (!%p3779_p12)  }
 0x114   : > { %1260 = vmatprep.subr.bf16.mxu0 %v4360_v6  ;;  %1342 = vmatprep.subr.bf16.mxu1 %v4363_v7  ;;  %v4402_v6 = vld [vmem:[#allocation5 + $0x94] ss:$8 sps:$4 sm:$0xff] (!%p3779_p12)  }
 0x117   : > { %1261 = vmatpush1.bf16.msra.mxu0 %v4358_v8  ;;  %1343 = vmatpush1.bf16.msra.mxu1 %v4361_v9  ;;  %v4404_v9 = vld [vmem:[#allocation5 + $0x90] ss:$8 sps:$4 sm:$0xff] (!%p3779_p12)  }
 0x118   : > { %1262 = vmatprep.subr.bf16.mxu0 %v4366_v10  ;;  %1344 = vmatprep.subr.bf16.mxu1 %v4369_v11  ;;  %v4405_v10 = vld [vmem:[#allocation5 + $0xa4] ss:$8 sps:$4 sm:$0xff] (!%p3779_p12)  }
 0x11b   : > { %1263 = vmatpush1.bf16.msra.mxu0 %v4364_v12  ;;  %1345 = vmatpush1.bf16.msra.mxu1 %v4367_v14  ;;  %v4407_v14 = vld [vmem:[#allocation5 + $0xa0] ss:$8 sps:$4 sm:$0xff] (!%p3779_p12)  }
 0x11c   : > { %1845 = vmatprep.subr.bf16.mxu0 (!%p3779_p12), %v4375_v34  ;;  %3961 = vmatprep.subr.bf16.mxu1 (!%p3779_p12), %v4793_v38  ;;  %v4476_v34 = vld [vmem:[#allocation7 + $0x1a4] ss:$16 sps:$4 sm:$0xff] (!%p3779_p12)  }
 0x11e   : > { %1265 = vmatmul.mubr.bf16.vlgmr.msra.gmra.mrb[0].mxu0 %v545_v15  ;;  %1347 = vmatmul.mubr.bf16.vlgmr.msra.gmra.mrb[0].mxu1 %v545_v15  ;;  %v4408_v15 = vld [vmem:[#allocation5 + $0xb4] ss:$8 sps:$4 sm:$0xff] (!%p3779_p12)  }
 0x11f   : > { %1846 = vmatpush1.bf16.msra.mxu0 (!%p3779_p12), %v4377_v35  ;;  %3962 = vmatpush3.bf16.msra.mxu1 (!%p3779_p12), %v4471_v18  ;;  %v4423_v35 = vld [vmem:[#allocation5 + $0x100] ss:$8 sps:$4 sm:$0xff] (!%p3779_p12)  }
 0x120   : > { %1847 = vmatprep.subr.bf16.mxu0 (!%p3779_p12), %v4378_v36  ;;  %3963 = vmatprep.subr.bf16.mxu1 (!%p3779_p12), %v4793_v38 }
 0x121   : > { %3977 = vmatprep.mubr.msk.bf16.mxu1 (!%p3779_p12), %vm4794_vm0, %v4793_v38 }
 0x123   : > { %1848 = vmatpush1.bf16.msra.mxu0 (!%p3779_p12), %v4380_v37  ;;  %v4428_v37 = vld [vmem:[#allocation5 + $0x114] ss:$8 sps:$4 sm:$0xff] (!%p3779_p12)  }
 0x124   : > { %1849 = vmatprep.subr.bf16.mxu0 (!%p3779_p12), %v4381_v39  ;;  %v4426_v39 = vld [vmem:[#allocation5 + $0x110] ss:$8 sps:$4 sm:$0xff] (!%p3779_p12)  }
 0x127   : > { %1850 = vmatpush1.bf16.msra.mxu0 (!%p3779_p12), %v4383_v40  ;;  %v4431_v40 = vld [vmem:[#allocation5 + $0x124] ss:$8 sps:$4 sm:$0xff] (!%p3779_p12)  }
 0x128   : > { %1851 = vmatprep.subr.bf16.mxu0 (!%p3779_p12), %v4384_v42  ;;  %v4429_v42 = vld [vmem:[#allocation5 + $0x120] ss:$8 sps:$4 sm:$0xff] (!%p3779_p12)  }
 0x12b   : > { %1852 = vmatpush1.bf16.msra.mxu0 (!%p3779_p12), %v4386_v43  ;;  %v4434_v43 = vld [vmem:[#allocation5 + $0x134] ss:$8 sps:$4 sm:$0xff] (!%p3779_p12)  }
 0x12c   : > { %1853 = vmatprep.subr.bf16.mxu0 (!%p3779_p12), %v4387_v44  ;;  %v4432_v44 = vld [vmem:[#allocation5 + $0x130] ss:$8 sps:$4 sm:$0xff] (!%p3779_p12)  }
 0x12f   : > { %1854 = vmatpush1.bf16.msra.mxu0 (!%p3779_p12), %v4389_v45  ;;  %v4437_v45 = vld [vmem:[#allocation5 + $0x144] ss:$8 sps:$4 sm:$0xff] (!%p3779_p12)  }
 0x130   : > { %1855 = vmatprep.subr.bf16.mxu0 (!%p3779_p12), %v4390_v46  ;;  %v4435_v46 = vld [vmem:[#allocation5 + $0x140] ss:$8 sps:$4 sm:$0xff] (!%p3779_p12)  }
 0x133   : > { %1856 = vmatpush1.bf16.msra.mxu0 (!%p3779_p12), %v4392_v52  ;;  %v4443_v52 = vld [vmem:[#allocation5 + $0x164] ss:$8 sps:$4 sm:$0xff] (!%p3779_p12)  }
 0x134   : > { %1857 = vmatprep.subr.bf16.mxu0 (!%p3779_p12), %v4393_v53  ;;  %v4441_v53 = vld [vmem:[#allocation5 + $0x160] ss:$8 sps:$4 sm:$0xff] (!%p3779_p12)  }
 0x137   : > { %1858 = vmatpush1.bf16.msra.mxu0 (!%p3779_p12), %v4395_v59  ;;  %v4450_v59 = vld [vmem:[#allocation5 + $0x190] ss:$8 sps:$4 sm:$0xff] (!%p3779_p12)  }
 0x138   : > { %1859 = vmatprep.subr.bf16.mxu0 (!%p3779_p12), %v4396_v60  ;;  %v4455_v60 = vld [vmem:[#allocation5 + $0x1a4] ss:$8 sps:$4 sm:$0xff] (!%p3779_p12)  }
 0x13b   : > { %1860 = vmatpush1.bf16.msra.mxu0 (!%p3779_p12), %v4398_v63  ;;  %v4456_v63 = vld [vmem:[#allocation5 + $0x1b0] ss:$8 sps:$4 sm:$0xff] (!%p3779_p12)  }
 0x13c   : > { %1861 = vmatprep.subr.bf16.mxu0 (!%p3779_p12), %v4399_v2  ;;  %v4462_v2 = vld [vmem:[#allocation5 + $0x1d0] ss:$8 sps:$4 sm:$0xff] (!%p3779_p12)  }
 0x13f   : > { %1862 = vmatpush1.bf16.msra.mxu0 (!%p3779_p12), %v4401_v5  ;;  %v4470_v5 = vld [vmem:[#allocation5 + $0x1f4] ss:$8 sps:$4 sm:$0xff] (!%p3779_p12)  }
 0x140   : > { %1863 = vmatprep.subr.bf16.mxu0 (!%p3779_p12), %v4402_v6  ;;  %v4468_v6 = vld [vmem:[#allocation5 + $0x1f0] ss:$8 sps:$4 sm:$0xff] (!%p3779_p12)  }
 0x143   : > { %1864 = vmatpush1.bf16.msra.mxu0 (!%p3779_p12), %v4404_v9  ;;  %v4478_v9 = vld [vmem:[#allocation7 + $0x1e4] ss:$16 sps:$4 sm:$0xff] (!%p3779_p12)  }
 0x144   : > { %1865 = vmatprep.subr.bf16.mxu0 (!%p3779_p12), %v4405_v10  ;;  %v1513_v10 = vld [vmem:[#allocation8 + $0x1] ss:$8 sm:$0x3] (!%p3779_p12) }
 0x147   : > { %1866 = vmatpush1.bf16.msra.mxu0 (!%p3779_p12), %v4407_v14 }
 0x148   : > { %1867 = vmatprep.subr.bf16.mxu0 (!%p3779_p12), %v4408_v15 }
 0x14b   : > { %1868 = vmatpush1.bf16.msra.mxu0 (!%p3779_p12), %v4410_v16 }
 0x14c   : > { %1869 = vmatprep.subr.bf16.mxu0 (!%p3779_p12), %v4411_v17 }
 0x1f1   : > { %v1266_v19 = vpop.f32.mrb[0].mxu0  ;;  %v1348_v20 = vpop.f32.mrb[0].mxu1 }
 0x1f2   : > { %v1268_v22 = vpop.f32.mrb[1].mxu0  ;;  %v1350_v23 = vpop.f32.mrb[1].mxu1 }
 0x1f3   : > { %v1359_v24 = vcombine.low %v1266_v19, %v1268_v22  ;;  %v1360_v25 = vcombine.low %v1348_v20, %v1350_v23  ;;  %v1270_v26 = vpop.f32.mrb[2].mxu0  ;;  %v1352_v27 = vpop.f32.mrb[2].mxu1  ;;  %v4472_v19 = vld [vmem:[#allocation7 + $0x124] ss:$16 sps:$4 sm:$0xff] (!%p3779_p12)   ;;  %v4413_v20 = vld [vmem:[#allocation5 + $0xc0] ss:$8 sps:$4 sm:$0xff] (!%p3779_p12)  }
 0x1f4   : > { %v1271_v28 = vpop.f32.mrb[3].mxu0  ;;  %v1353_v13 = vpop.f32.mrb[3].mxu1  ;;  %v4414_v22 = vld [vmem:[#allocation5 + $0xd4] ss:$8 sps:$4 sm:$0xff] (!%p3779_p12)   ;;  %v4416_v23 = vld [vmem:[#allocation5 + $0xd0] ss:$8 sps:$4 sm:$0xff] (!%p3779_p12)   ;;  %3964 = vmatpush3.bf16.msra.mxu1 (!%p3779_p12), %v4472_v19  ;;  %1870 = vmatpush1.bf16.msra.mxu0 (!%p3779_p12), %v4413_v20 }
 0x1f5   : > { %v1367_v29 = vrot.slane %v1359_v24, %v5213_v21  ;;  %v1374_v30 = vrot.slane %v1360_v25, %v5213_v21  ;;  %1382 = sbr.rel (%p3779_p12) target bundleno = 2605 (0xa2d), region = 80  ;;  %v4473_v24 = vld [vmem:[#allocation7 + $0x144] ss:$16 sps:$4 sm:$0xff] (!%p3779_p12)   ;;  %3965 = vmatprep.subr.bf16.mxu1 (!%p3779_p12), %v4793_v38  ;;  %1871 = vmatprep.subr.bf16.mxu0 (!%p3779_p12), %v4414_v22  ;;  %v4419_v28 = vld [vmem:[#allocation5 + $0xe0] ss:$8 sps:$4 sm:$0xff] (!%p3779_p12)  }
 0x1f6   : > { %v4417_v25 = vld [vmem:[#allocation5 + $0xe4] ss:$8 sps:$4 sm:$0xff] (!%p3779_p12)   ;;  %v4420_v13 = vld [vmem:[#allocation5 + $0xf4] ss:$8 sps:$4 sm:$0xff] (!%p3779_p12)   ;;  %v4479_v19 = vld [vmem:[#allocation7 + $0x100] ss:$16 sps:$4 sm:$0xff] (!%p3779_p12)  }
 0x1f7   : > { %v1375_v32 = vcombine.low %v1367_v29, %v1374_v30  ;;  %v4474_v27 = vld [vmem:[#allocation7 + $0x164] ss:$16 sps:$4 sm:$0xff] (!%p3779_p12)   ;;  %v4480_v22 = vld [vmem:[#allocation7 + $0x120] ss:$16 sps:$4 sm:$0xff] (!%p3779_p12)  }
 0x1f8   : > { %3966 = vmatpush3.bf16.msra.mxu1 (!%p3779_p12), %v4473_v24  ;;  %1872 = vmatpush1.bf16.msra.mxu0 (!%p3779_p12), %v4416_v23  ;;  %v4475_v30 = vld [vmem:[#allocation7 + $0x184] ss:$16 sps:$4 sm:$0xff] (!%p3779_p12)   ;;  %v4481_v23 = vld [vmem:[#allocation7 + $0x140] ss:$16 sps:$4 sm:$0xff] (!%p3779_p12)  }
 0x1f9   : > { %v1377_v33 = vadd.f32 %v1375_v32, %v392_v31  ;;  %3967 = vmatprep.subr.bf16.mxu1 (!%p3779_p12), %v4793_v38  ;;  %1873 = vmatprep.subr.bf16.mxu0 (!%p3779_p12), %v4417_v25  ;;  %v4422_v31 = vld [vmem:[#allocation5 + $0xf0] ss:$8 sps:$4 sm:$0xff] (!%p3779_p12)   ;;  %v4425_v32 = vld [vmem:[#allocation5 + $0x104] ss:$8 sps:$4 sm:$0xff] (!%p3779_p12)  }
 0x1fa   : > { %v4482_v24 = vld [vmem:[#allocation7 + $0x160] ss:$16 sps:$4 sm:$0xff] (!%p3779_p12)  }
 0x1fb   : > { %1378 = vst [vmem:[#allocation2] sm:$0xff] %v1377_v33  ;;  %v4483_v25 = vld [vmem:[#allocation7 + $0x180] ss:$16 sps:$4 sm:$0xff] (!%p3779_p12)  }
 0x1fc   : > { %3968 = vmatpush3.bf16.msra.mxu1 %v4474_v27  ;;  %1874 = vmatpush1.bf16.msra.mxu0 %v4419_v28  ;;  %v1518_v27 = vrot.slane %v1513_v10, %v5220_v48  ;;  %v4485_v28 = vld [vmem:[#allocation7 + $0x1c0] ss:$16 sps:$4 sm:$0xff]  }
 0x1fd   : > { %3969 = vmatprep.subr.bf16.mxu1 %v4793_v38  ;;  %1875 = vmatprep.subr.bf16.mxu0 %v4420_v13 }
 0x200   : > { %3970 = vmatpush3.bf16.msra.mxu1 %v4475_v30  ;;  %1876 = vmatpush1.bf16.msra.mxu0 %v4422_v31  ;;  %v4487_v31 = vld [vmem:[#allocation7 + $0x108] ss:$16 sps:$4 sm:$0xff]  }
 0x201   : > { %3971 = vmatprep.subr.bf16.mxu1 %v4793_v38  ;;  %1886 = vmatprep.subr.bf16.mxu0 %v4425_v32 }
 0x202   : > { %v1383_v1 = vld [vmem:[#allocation2] sm:$0xff] }
 0x203   : > { %v1420_v4 = vadd.f32 %v1418_v3, %v1383_v1  ;;  %v4464_v1 = vld [vmem:[#allocation5 + $0x1d4] ss:$8 sps:$4 sm:$0xff]   ;;  %v4467_v3 = vld [vmem:[#allocation5 + $0x1e4] ss:$8 sps:$4 sm:$0xff]  }
 0x204   : > { %3972 = vmatpush3.bf16.msra.mxu1 %v4476_v34  ;;  %v4489_v34 = vld [vmem:[#allocation7 + $0x148] ss:$16 sps:$4 sm:$0xff]  }
 0x205   : > { %v1421_v7 = vmax.f32 %v1420_v4, 0.0  ;;  %3973 = vmatprep.subr.bf16.mxu1 %v4793_v38  ;;  %v4465_v4 = vld [vmem:[#allocation5 + $0x1e0] ss:$8 sps:$4 sm:$0xff]  }
 0x207   : > { %v1430_v8 = vrot.slane %v1421_v7, %v5213_v21  ;;  %v1423_v26 = vcombine.high %v1421_v7, %v1421_v7 }
 0x209   : > { %v1438_v11 = vcombine.high %v1430_v8, %v1430_v8  ;;  %v5235_v29 = vrot.slane %v1423_v26, %v5213_v21  ;;  %v1444_v36 = vpack.c.bf16 %v1430_v8, %v1430_v8  ;;  %v4477_v8 = vld [vmem:[#allocation7 + $0x1c4] ss:$16 sps:$4 sm:$0xff]   ;;  %v4484_v26 = vld [vmem:[#allocation7 + $0x1a0] ss:$16 sps:$4 sm:$0xff]  }
 0x20a   : > { %3974 = vmatpush3.bf16.msra.mxu1 %v4477_v8 }
 0x20b   : > { %v1445_v12 = vpack.c.bf16 %v1438_v11, %v1438_v11  ;;  %v1439_v33 = vcombine.high %v5235_v29, %v5235_v29  ;;  %v1446_v7 = vpack.c.bf16 %v5235_v29, %v5235_v29  ;;  %3975 = vmatprep.subr.bf16.mxu1 %v4793_v38  ;;  %v1522_v11 = vrot.slane %v1513_v10, %v5223_v49  ;;  %v4486_v29 = vld [vmem:[#allocation7 + $0x1e0] ss:$16 sps:$4 sm:$0xff]  }
 0x20d   : > { %1877 = vmatprep.mubr.bf16.mxu0 %v1445_v12  ;;  %v1447_v21 = vpack.c.bf16 %v1439_v33, %v1439_v33  ;;  %v4488_v33 = vld [vmem:[#allocation7 + $0x128] ss:$16 sps:$4 sm:$0xff]  }
 0x20e   : > { %1878 = vmatmul.mubr.bf16.vlgmr.msra.gmra.mrb[0].mxu0 %v1444_v36  ;;  %3976 = vmatpush3.bf16.msra.mxu1 %v4478_v9  ;;  %v4491_v36 = vld [vmem:[#allocation7 + $0x188] ss:$16 sps:$4 sm:$0xff]  }
 0x20f   : > { %1887 = vmatpush1.bf16.msra.mxu0 %v4423_v35  ;;  %1918 = vmatprep.mubr.bf16.mxu0 %v1447_v21  ;;  %v4490_v35 = vld [vmem:[#allocation7 + $0x168] ss:$16 sps:$4 sm:$0xff]  }
 0x210   : > { %1888 = vmatprep.subr.bf16.mxu0 %v4428_v37  ;;  %3981 = vmatprep.subr.bf16.mxu1 %v4793_v38  ;;  %v4492_v37 = vld [vmem:[#allocation7 + $0x1a8] ss:$16 sps:$4 sm:$0xff]  }
 0x211   : > { %v4493_v21 = vld [vmem:[#allocation7 + $0x1c8] ss:$16 sps:$4 sm:$0xff]  }
 0x213   : > { %1889 = vmatpush1.bf16.msra.mxu0 %v4426_v39  ;;  %v4494_v39 = vld [vmem:[#allocation7 + $0x1e8] ss:$16 sps:$4 sm:$0xff]  }
 0x214   : > { %1890 = vmatprep.subr.bf16.mxu0 %v4431_v40  ;;  %v2141_v40 = vld [vmem:[%s5432_s5] sm:$0x1] }
 0x217   : > { %1891 = vmatpush1.bf16.msra.mxu0 %v4429_v42  ;;  %v4495_v42 = vld [vmem:[#allocation7 + $0x10c] ss:$16 sps:$4 sm:$0xff]  }
 0x218   : > { %1892 = vmatprep.subr.bf16.mxu0 %v4434_v43  ;;  %v4496_v43 = vld [vmem:[#allocation7 + $0x12c] ss:$16 sps:$4 sm:$0xff]  }
 0x21b   : > { %1893 = vmatpush1.bf16.msra.mxu0 %v4432_v44  ;;  %v4497_v44 = vld [vmem:[#allocation7 + $0x14c] ss:$16 sps:$4 sm:$0xff]  }
 0x21c   : > { %1894 = vmatprep.subr.bf16.mxu0 %v4437_v45  ;;  %v4498_v45 = vld [vmem:[#allocation7 + $0x16c] ss:$16 sps:$4 sm:$0xff]  }
 0x21f   : > { %1895 = vmatpush1.bf16.msra.mxu0 %v4435_v46  ;;  %v4499_v46 = vld [vmem:[#allocation7 + $0x18c] ss:$16 sps:$4 sm:$0xff]  }
 0x220   : > { %1896 = vmatprep.subr.bf16.mxu0 %v4440_v50  ;;  %v4500_v50 = vld [vmem:[#allocation7 + $0x1ac] ss:$16 sps:$4 sm:$0xff]  }
 0x223   : > { %1897 = vmatpush1.bf16.msra.mxu0 %v4438_v51  ;;  %v4501_v51 = vld [vmem:[#allocation7 + $0x1cc] ss:$16 sps:$4 sm:$0xff]  }
 0x224   : > { %1898 = vmatprep.subr.bf16.mxu0 %v4443_v52  ;;  %v4502_v52 = vld [vmem:[#allocation7 + $0x1ec] ss:$16 sps:$4 sm:$0xff]  }
 0x227   : > { %1899 = vmatpush1.bf16.msra.mxu0 %v4441_v53 }
 0x228   : > { %1900 = vmatprep.subr.bf16.mxu0 %v4446_v54 }
 0x22b   : > { %1901 = vmatpush1.bf16.msra.mxu0 %v4444_v55 }
 0x22c   : > { %1902 = vmatprep.subr.bf16.mxu0 %v4449_v56 }
 0x22f   : > { %1903 = vmatpush1.bf16.msra.mxu0 %v4447_v57 }
 0x230   : > { %1904 = vmatprep.subr.bf16.mxu0 %v4452_v58  ;;  %v2139_v58 = vld [vmem:[#allocation8 + $0x11] ss:$0 sm:$0xff] }
 0x233   : > { %1905 = vmatpush1.bf16.msra.mxu0 %v4450_v59 }
 0x234   : > { %1906 = vmatprep.subr.bf16.mxu0 %v4455_v60 }
 0x237   : > { %1907 = vmatpush1.bf16.msra.mxu0 %v4453_v61 }
 0x238   : > { %1908 = vmatprep.subr.bf16.mxu0 %v4458_v62 }
 0x23b   : > { %1909 = vmatpush1.bf16.msra.mxu0 %v4456_v63 }
 0x23c   : > { %1910 = vmatprep.subr.bf16.mxu0 %v4461_v47 }
 0x23f   : > { %1911 = vmatpush1.bf16.msra.mxu0 %v4459_v0 }
 0x240   : > { %1912 = vmatprep.subr.bf16.mxu0 %v4464_v1  ;;  %v2158_v1 = vld [vmem:[#allocation8 + $0x19] ss:$0 sm:$0xff] }
 0x243   : > { %1913 = vmatpush1.bf16.msra.mxu0 %v4462_v2 }
 0x244   : > { %1914 = vmatprep.subr.bf16.mxu0 %v4467_v3 }
 0x247   : > { %1915 = vmatpush1.bf16.msra.mxu0 %v4465_v4 }
 0x248   : > { %1916 = vmatprep.subr.bf16.mxu0 %v4470_v5 }
 0x24b   : > { %1917 = vmatpush1.bf16.msra.mxu0 %v4468_v6 }
 0x24c   : > { %4041 = vmatprep.subr.mxu0 %v4793_v38 }
 0x24e   : > { %1919 = vmatmul.mubr.bf16.vlgmr.msra.gmra.mrb[0].mxu0 %v1446_v7 }
 0x24f   : > { %4043 = vmatprep.mubr.msk.f32.mxu0 %vm4794_vm0, %v4793_v38 }
 0x321   : > { %v1920_v12 = vpop.f32.mrb[0].mxu0 }
 0x322   : > { %v1922_v14 = vpop.f32.mrb[1].mxu0  ;;  %v4079_v13 = vadd.f32 %v1920_v12, %v1518_v27 }
 0x323   : > { %v4080_v15 = vadd.f32 %v1922_v14, %v1522_v11  ;;  %v1924_v16 = vpop.f32.mrb[2].mxu0  ;;  %v2265_v14 = vld [vmem:[#allocation8 + $0x2] ss:$0 sm:$0xff] }
 0x324   : > { %v1925_v17 = vpop.f32.mrb[3].mxu0  ;;  %v1927_v30 = vmax.f32 %v4079_v13, 0.0  ;;  %v4503_v13 = vld [vmem:[#allocation7 + $0x8] ss:$16 sps:$4 sm:$0xff]  }
 0x325   : > { %v1928_v18 = vmax.f32 %v4080_v15, 0.0 }
 0x326   : > { %v1929_v32 = vpack.c.bf16 %v1927_v30, %v1927_v30 }
 0x327   : > { %v1946_v20 = vpack.c.bf16 %v1928_v18, %v1928_v18 }
 0x329   : > { %3978 = vmatmul.mubr.bf16.vlgmr.msra.gmra.mrb[0].mxu1 %v1946_v20 }
 0x32a   : > { %3982 = vmatpush3.bf16.msra.mxu1 %v4479_v19  ;;  %3997 = vmatprep.mubr.msk.bf16.mxu1 %vm4794_vm0, %v4793_v38 }
 0x32b   : > { %3983 = vmatprep.subr.bf16.mxu1 %v4793_v38 }
 0x32e   : > { %3984 = vmatpush3.bf16.msra.mxu1 %v4480_v22 }
 0x32f   : > { %3985 = vmatprep.subr.bf16.mxu1 %v4793_v38 }
 0x332   : > { %3986 = vmatpush3.bf16.msra.mxu1 %v4481_v23  ;;  %v4505_v23 = vld [vmem:[#allocation7 + $0xc] ss:$16 sps:$4 sm:$0xff]  }
 0x333   : > { %3987 = vmatprep.subr.bf16.mxu1 %v4793_v38 }
 0x336   : > { %3988 = vmatpush3.bf16.msra.mxu1 %v4482_v24  ;;  %v4795_v24 = vmov 0  }
 0x337   : > { %3989 = vmatprep.subr.bf16.mxu1 %v4793_v38  ;;  %4370 = vset.pattern.permute.xlu0 %v4795_v24 }
 0x338   : > { %4371 = vset.pattern.permute.xlu1 %v4795_v24 }
 0x33a   : > { %3990 = vmatpush3.bf16.msra.mxu1 %v4483_v25  ;;  %v2354_v25 = vld [vmem:[%s5433_s6] sm:$0x3] }
 0x33b   : > { %3991 = vmatprep.subr.bf16.mxu1 %v4793_v38 }
 0x33e   : > { %3992 = vmatpush3.bf16.msra.mxu1 %v4484_v26 }
 0x33f   : > { %3993 = vmatprep.subr.bf16.mxu1 %v4793_v38 }
 0x342   : > { %3994 = vmatpush3.bf16.msra.mxu1 %v4485_v28 }
 0x343   : > { %3995 = vmatprep.subr.bf16.mxu1 %v4793_v38 }
 0x346   : > { %3996 = vmatpush3.bf16.msra.mxu1 %v4486_v29  ;;  %v4508_v29 = vld [vmem:[#allocation7 + $0x4] ss:$16 sps:$4 sm:$0xff]  }
 0x347   : > { %4001 = vmatprep.subr.bf16.mxu1 %v4793_v38 }
 0x349   : > { %3998 = vmatmul.mubr.bf16.vlgmr.msra.gmra.mrb[4].mxu1 %v1929_v32  ;;  %v4506_v32 = vld [vmem:[#allocation7] ss:$16 sps:$4 sm:$0xff]  }
 0x34a   : > { %4002 = vmatpush3.bf16.msra.mxu1 %v4487_v31  ;;  %4017 = vmatprep.mubr.msk.bf16.mxu1 %vm4794_vm0, %v4793_v38  ;;  %v4511_v31 = vld [vmem:[#allocation7 + $0x2c] ss:$16 sps:$4 sm:$0xff]  }
 0x34b   : > { %4003 = vmatprep.subr.bf16.mxu1 %v4793_v38 }
 0x34e   : > { %4004 = vmatpush3.bf16.msra.mxu1 %v4488_v33  ;;  %v4509_v33 = vld [vmem:[#allocation7 + $0x28] ss:$16 sps:$4 sm:$0xff]  }
 0x34f   : > { %4005 = vmatprep.subr.bf16.mxu1 %v4793_v38 }
 0x352   : > { %4006 = vmatpush3.bf16.msra.mxu1 %v4489_v34  ;;  %v4514_v34 = vld [vmem:[#allocation7 + $0x24] ss:$16 sps:$4 sm:$0xff]  }
 0x353   : > { %4007 = vmatprep.subr.bf16.mxu1 %v4793_v38 }
 0x356   : > { %4008 = vmatpush3.bf16.msra.mxu1 %v4490_v35  ;;  %v4517_v35 = vld [vmem:[#allocation7 + $0x4c] ss:$16 sps:$4 sm:$0xff]  }
 0x357   : > { %4009 = vmatprep.subr.bf16.mxu1 %v4793_v38 }
 0x35a   : > { %4010 = vmatpush3.bf16.msra.mxu1 %v4491_v36  ;;  %v4512_v36 = vld [vmem:[#allocation7 + $0x20] ss:$16 sps:$4 sm:$0xff]  }
 0x35b   : > { %4011 = vmatprep.subr.bf16.mxu1 %v4793_v38 }
 0x35e   : > { %4012 = vmatpush3.bf16.msra.mxu1 %v4492_v37  ;;  %v4515_v37 = vld [vmem:[#allocation7 + $0x48] ss:$16 sps:$4 sm:$0xff]  }
 0x35f   : > { %4013 = vmatprep.subr.bf16.mxu1 %v4793_v38 }
 0x362   : > { %4014 = vmatpush3.bf16.msra.mxu1 %v4493_v21  ;;  %v4520_v21 = vld [vmem:[#allocation7 + $0x44] ss:$16 sps:$4 sm:$0xff]  }
 0x363   : > { %4015 = vmatprep.subr.bf16.mxu1 %v4793_v38 }
 0x366   : > { %4016 = vmatpush3.bf16.msra.mxu1 %v4494_v39  ;;  %v4523_v39 = vld [vmem:[#allocation7 + $0x6c] ss:$16 sps:$4 sm:$0xff]  }
 0x367   : > { %4021 = vmatprep.subr.bf16.mxu1 %v4793_v38 }
 0x369   : > { %4018 = vmatmul.mubr.bf16.vlgmr.msra.gmra.mrb[8].mxu1 %v2141_v40  ;;  %v4518_v40 = vld [vmem:[#allocation7 + $0x40] ss:$16 sps:$4 sm:$0xff]  }
 0x36a   : > { %4037 = vmatprep.mubr.msk.bf16.mxu1 %vm4794_vm0, %v4793_v38  ;;  %4022 = vmatpush3.bf16.msra.mxu1 %v4495_v42  ;;  %v4521_v42 = vld [vmem:[#allocation7 + $0x68] ss:$16 sps:$4 sm:$0xff]  }
 0x36b   : > { %4023 = vmatprep.subr.bf16.mxu1 %v4793_v38 }
 0x36e   : > { %4024 = vmatpush3.bf16.msra.mxu1 %v4496_v43  ;;  %v4526_v43 = vld [vmem:[#allocation7 + $0x64] ss:$16 sps:$4 sm:$0xff]  }
 0x36f   : > { %4025 = vmatprep.subr.bf16.mxu1 %v4793_v38 }
 0x372   : > { %4026 = vmatpush3.bf16.msra.mxu1 %v4497_v44  ;;  %v4529_v44 = vld [vmem:[#allocation7 + $0x8c] ss:$16 sps:$4 sm:$0xff]  }
 0x373   : > { %4027 = vmatprep.subr.bf16.mxu1 %v4793_v38 }
 0x376   : > { %4028 = vmatpush3.bf16.msra.mxu1 %v4498_v45  ;;  %v4524_v45 = vld [vmem:[#allocation7 + $0x60] ss:$16 sps:$4 sm:$0xff]  }
 0x377   : > { %4029 = vmatprep.subr.bf16.mxu1 %v4793_v38 }
 0x37a   : > { %4030 = vmatpush3.bf16.msra.mxu1 %v4499_v46  ;;  %v4527_v46 = vld [vmem:[#allocation7 + $0x88] ss:$16 sps:$4 sm:$0xff]  }
 0x37b   : > { %4031 = vmatprep.subr.bf16.mxu1 %v4793_v38 }
 0x37e   : > { %4032 = vmatpush3.bf16.msra.mxu1 %v4500_v50  ;;  %v4532_v50 = vld [vmem:[#allocation7 + $0x84] ss:$16 sps:$4 sm:$0xff]  }
 0x37f   : > { %4033 = vmatprep.subr.bf16.mxu1 %v4793_v38 }
 0x382   : > { %4034 = vmatpush3.bf16.msra.mxu1 %v4501_v51  ;;  %v4535_v51 = vld [vmem:[#allocation7 + $0xac] ss:$16 sps:$4 sm:$0xff]  }
 0x383   : > { %4035 = vmatprep.subr.bf16.mxu1 %v4793_v38 }
 0x386   : > { %4036 = vmatpush3.bf16.msra.mxu1 %v4502_v52  ;;  %v4530_v52 = vld [vmem:[#allocation7 + $0x80] ss:$16 sps:$4 sm:$0xff]  }
 0x387   : > { %4046 = vmatprep.subr.mxu1 %v4793_v38 }
 0x3fc   : > { %v2045_v53 = vpop.f32.mrb[0].mxu1 }
 0x3fd   : > { %v3979_v54 = vpop.f32.mrb[1].mxu1 }
 0x3fe   : > { %v2048_v55 = vpop.f32.mrb[2].mxu1  ;;  %v4538_v54 = vld [vmem:[#allocation7 + $0xa4] ss:$16 sps:$4 sm:$0xff]  }
 0x3ff   : > { %v3980_v56 = vpop.f32.mrb[3].mxu1  ;;  %v4541_v55 = vld [vmem:[#allocation7 + $0xcc] ss:$16 sps:$4 sm:$0xff]  }
 0x400   : > { %v4536_v56 = vld [vmem:[#allocation7 + $0xa0] ss:$16 sps:$4 sm:$0xff]  }
 0x41c   : > { %v2133_v57 = vpop.f32.mrb[4].mxu1 }
 0x41d   : > { %v2134_v59 = vadd.f32 %v2133_v57, %v2045_v53  ;;  %v3999_v60 = vpop.f32.mrb[5].mxu1  ;;  %v4533_v53 = vld [vmem:[#allocation7 + $0xa8] ss:$16 sps:$4 sm:$0xff]  }
 0x41e   : > { %v2136_v61 = vpop.f32.mrb[6].mxu1  ;;  %v4539_v57 = vld [vmem:[#allocation7 + $0xc8] ss:$16 sps:$4 sm:$0xff]   ;;  %v4542_v60 = vld [vmem:[#allocation7 + $0xc0] ss:$16 sps:$4 sm:$0xff]  }
 0x41f   : > { %v5287_v62 = vadd.f32 %v2139_v58, %v2134_v59  ;;  %v4000_v63 = vpop.f32.mrb[7].mxu1  ;;  %v4544_v58 = vld [vmem:[#allocation7 + $0xc4] ss:$16 sps:$4 sm:$0xff]   ;;  %v4547_v59 = vld [vmem:[#allocation7 + $0xec] ss:$16 sps:$4 sm:$0xff]  }
 0x420   : > { %v4545_v61 = vld [vmem:[#allocation7 + $0xe8] ss:$16 sps:$4 sm:$0xff]   ;;  %v4550_v63 = vld [vmem:[#allocation7 + $0xe4] ss:$16 sps:$4 sm:$0xff]  }
 0x421   : > { %v2358_v47 = vmul.f32 %v5287_v62, %v5287_v62 }
 0x423   : > { %v2360_v0 = vsel %vm2359_vm1, %v2358_v47, 0.0  ;;  %v4548_v47 = vld [vmem:[#allocation7 + $0xe0] ss:$16 sps:$4 sm:$0xff]  }
 0x424   : > { %2361 = vadd.xlane.f32.xlu0 %v2360_v0 }
 0x43c   : > { %v2241_v2 = vpop.f32.mrb[8].mxu1 }
 0x43d   : > { %v2242_v3 = vadd.f32 %v2241_v2, %v2158_v1  ;;  %v4019_v4 = vpop.f32.mrb[9].mxu1  ;;  %v2634_v1 = vpack.c.bf16 %v5287_v62, %v5287_v62 }
 0x43e   : > { %v2244_v5 = vpop.f32.mrb[10].mxu1 }
 0x43f   : > { %v2247_v6 = vmax.f32 %v2242_v3, 0.0  ;;  %v4020_v7 = vpop.f32.mrb[11].mxu1 }
 0x441   : > { %v2248_v8 = vpack.c.bf16 %v2247_v6, %v2247_v6  ;;  %v2803_v6 = vld [vmem:[#allocation8 + $0x3] ss:$8 sm:$0x3] }
 0x442   : > { %v2808_v7 = vrot.slane %v2803_v6, %v5220_v48 }
 0x443   : > { %4038 = vmatmul.mubr.bf16.vlgmr.msra.gmra.mrb[12].mxu1 %v2248_v8  ;;  %v2652_v8 = vld [vmem:[#allocation8 + $0xa] ss:$8 sm:$0x3] }
 0x444   : > { %4048 = vmatprep.mubr.msk.f32.mxu1 %vm4794_vm0, %v4793_v38 }
 0x4b1   : > { %v2362_v9 = vpop.xlane.xlu0 %2361 }
 0x4b2   : > { %v2363_v10 = vmax.f32 %v2362_v9, 1e-24 }
 0x4b4   : > { %4551 = vrsqrt.f32 %v2363_v10  ;;  %v2812_v10 = vrot.slane %v2803_v6, %v5223_v49 }
 0x4be   : > { %v4552_v11 = vpop.eup %4551 }
 0x4bf   : > { %v2365_v12 = vmul.f32 %v4552_v11, %v5287_v62  ;;  %v3876_v62 = vld [vmem:[#allocation10] ss:$0 sm:$0xff] }
 0x4c0   : > { %vm2530_vm2 = vcmp.eq.f32.partialorder %v3876_v62, 0.0 }
 0x4c1   : > { %4047 = vmatpush3.xpose.msra.mxu1 %v2365_v12 }
 0x4c2   : > { %2895 = vmatprep.subr.bf16.mxu1 %v4505_v23 }
 0x516   : > { %v2348_v15 = vpop.f32.mrb[12].mxu1 }
 0x517   : > { %v5295_v16 = vadd.f32 %v2348_v15, %v2265_v14  ;;  %v4039_v17 = vpop.f32.mrb[13].mxu1  ;;  %v2661_v14 = vrot.slane %v2652_v8, %v5223_v49 }
 0x518   : > { %v2351_v18 = vpop.f32.mrb[14].mxu1 }
 0x519   : > { %v4040_v19 = vpop.f32.mrb[15].mxu1  ;;  %v2366_v20 = vmul.f32 %v5295_v16, %v5295_v16  ;;  %v2785_v0 = vpack.c.bf16 %v5295_v16, %v5295_v16 }
 0x51b   : > { %v2367_v22 = vsel %vm2359_vm1, %v2366_v20, 0.0 }
 0x51c   : > { %2368 = vadd.xlane.f32.xlu0 %v2367_v22  ;;  %v2657_v22 = vrot.slane %v2652_v8, %v5220_v48 }
 0x532   : > { %2521 = vperm.xlu0 %4370, %v2354_v25  }
 0x5a9   : > { %v2369_v26 = vpop.xlane.xlu0 %2368 }
 0x5aa   : > { %v2370_v27 = vmax.f32 %v2369_v26, 1e-24  ;;  %v2531_v26 = vsel %vm2530_vm2, 1.0, %v4793_v38 }
 0x5ac   : > { %4553 = vrsqrt.f32 %v2370_v27 }
 0x5b6   : > { %v4554_v28 = vpop.eup %4553 }
 0x5b7   : > { %v2372_v30 = vmul.f32 %v4554_v28, %v5295_v16  ;;  %v2522_v16 = vpop.permute.xlu0 %2521 }
 0x5b8   : > { %vm2532_vm3 = vcmp.eq.f32.partialorder %v2522_v16, 0.0 }
 0x5b9   : > { %4042 = vmatpush3.xpose.msra.mxu0 %v2372_v30  ;;  %4049 = vmatmul.mubr.f32.vlgmr.msra.gmra.mrb[16].mxu1 %v2372_v30  ;;  %v2533_v48 = vsel %vm2532_vm3, %v2531_v26, %v3876_v62 }
 0x5ba   : > { %2896 = vmatpush1.bf16.msra.mxu1 %v4503_v13  ;;  %2744 = vmatprep.subr.bf16.mxu0 %v4508_v29  ;;  %v2535_v30 = vsel %vm2534_vm4, %v2533_v48, 0.0 }
 0x5bb   : > { %2897 = vmatprep.subr.bf16.mxu1 %v4511_v31  ;;  %2927 = vmatprep.mubr.bf16.mxu1 %v4795_v24  ;;  %v2357_v31 = vld [vmem:[#allocation8 + $0x1b] ss:$0 sm:$0xff] }
 0x5bc   : > { %4044 = vmatmul.mubr.f32.vlgmr.msra.gmra.mrb[4].mxu0 %v2365_v12 }
 0x5bd   : > { %2745 = vmatpush1.bf16.msra.mxu0 %v4506_v32  ;;  %2776 = vmatprep.mubr.bf16.mxu0 %v4795_v24  ;;  %v2356_v32 = vld [vmem:[#allocation8 + $0x1a] ss:$0 sm:$0xff] }
 0x5be   : > { %2898 = vmatpush1.bf16.msra.mxu1 %v4509_v33  ;;  %2746 = vmatprep.subr.bf16.mxu0 %v4514_v34 }
 0x5bf   : > { %2899 = vmatprep.subr.bf16.mxu1 %v4517_v35 }
 0x5c1   : > { %2747 = vmatpush1.bf16.msra.mxu0 %v4512_v36 }
 0x5c2   : > { %2900 = vmatpush1.bf16.msra.mxu1 %v4515_v37  ;;  %2748 = vmatprep.subr.bf16.mxu0 %v4520_v21  ;;  %v3360_v21 = vld [vmem:[#allocation8 + $0x18] sm:$0xf0] }
 0x5c3   : > { %2901 = vmatprep.subr.bf16.mxu1 %v4523_v39 }
 0x5c5   : > { %2749 = vmatpush1.bf16.msra.mxu0 %v4518_v40 }
 0x5c6   : > { %2902 = vmatpush1.bf16.msra.mxu1 %v4521_v42  ;;  %2750 = vmatprep.subr.bf16.mxu0 %v4526_v43  ;;  %v3364_v42 = vrot.slane %v3360_v21, 4 }
 0x5c7   : > { %2903 = vmatprep.subr.bf16.mxu1 %v4529_v44  ;;  %v3358_v44 = vld [vmem:[#allocation8 + $0x8] sm:$0xf0] }
 0x5c9   : > { %2751 = vmatpush1.bf16.msra.mxu0 %v4524_v45 }
 0x5ca   : > { %2904 = vmatpush1.bf16.msra.mxu1 %v4527_v46  ;;  %2752 = vmatprep.subr.bf16.mxu0 %v4532_v50  ;;  %v3357_v50 = vld [vmem:[#allocation8] sm:$0xf0] }
 0x5cb   : > { %2905 = vmatprep.subr.bf16.mxu1 %v4535_v51 }
 0x5cd   : > { %2753 = vmatpush1.bf16.msra.mxu0 %v4530_v52  ;;  %v3440_v52 = vrot.slane %v3358_v44, 4 }
 0x5ce   : > { %2906 = vmatpush1.bf16.msra.mxu1 %v4533_v53  ;;  %2754 = vmatprep.subr.bf16.mxu0 %v4538_v54 }
 0x5cf   : > { %2907 = vmatprep.subr.bf16.mxu1 %v4541_v55 }
 0x5d1   : > { %2755 = vmatpush1.bf16.msra.mxu0 %v4536_v56  ;;  %v3439_v56 = vrot.slane %v3357_v50, 4 }
 0x5d2   : > { %2908 = vmatpush1.bf16.msra.mxu1 %v4539_v57  ;;  %2756 = vmatprep.subr.bf16.mxu0 %v4544_v58 }
 0x5d3   : > { %2909 = vmatprep.subr.bf16.mxu1 %v4547_v59 }
 0x5d5   : > { %2757 = vmatpush1.bf16.msra.mxu0 %v4542_v60 }
 0x5d6   : > { %2910 = vmatpush1.bf16.msra.mxu1 %v4545_v61  ;;  %2758 = vmatprep.subr.bf16.mxu0 %v4550_v63 }
 0x5d7   : > { %4056 = vmatprep.subr.mxu1 %v4793_v38 }
 0x5d9   : > { %2928 = vmatmul.mubr.bf16.vlgmr.msra.gmra.mrb[20].mxu1 %v2785_v0  ;;  %2759 = vmatpush1.bf16.msra.mxu0 %v4548_v47 }
 0x5da   : > { %4051 = vmatprep.subr.mxu0 %v4793_v38  ;;  %4058 = vmatprep.mubr.msk.f32.mxu1 %vm4794_vm0, %v4793_v38 }
 0x5dc   : > { %2777 = vmatmul.mubr.bf16.vlgmr.msra.gmra.mrb[8].mxu0 %v2634_v1 }
 0x5dd   : > { %4053 = vmatprep.mubr.msk.f32.mxu0 %vm4794_vm0, %v4793_v38 }
 0x68c   : > { %v5314_v2 = vpop.f32.mrb[16].mxu1 }
 0x68d   : > { %v4050_v3 = vpop.f32.mrb[17].mxu1 }
 0x68f   : > { %v5316_v4 = vpop.f32.mrb[4].mxu0 }
 0x690   : > { %v4045_v5 = vpop.f32.mrb[5].mxu0 }
 0x6ac   : > { %v2929_v9 = vpop.f32.mrb[20].mxu1 }
 0x6ad   : > { %v5320_v11 = vadd.f32 %v2929_v9, %v2808_v7  ;;  %v2931_v12 = vpop.f32.mrb[21].mxu1 }
 0x6ae   : > { %v2933_v15 = vpop.f32.mrb[22].mxu1  ;;  %v2932_v20 = vadd.f32 %v2931_v12, %v2812_v10 }
 0x6af   : > { %v2934_v17 = vpop.f32.mrb[23].mxu1  ;;  %4052 = vmatpush3.xpose.msra.mxu0 %v5320_v11  ;;  %v2778_v18 = vpop.f32.mrb[8].mxu0  ;;  %v3121_v19 = vmul.f32 %v5320_v11, %v5320_v11 }
 0x6b0   : > { %v2780_v23 = vpop.f32.mrb[9].mxu0  ;;  %4061 = vmatprep.subr.mxu0 %v4793_v38  ;;  %v2779_v13 = vadd.f32 %v2778_v18, %v2657_v22 }
 0x6b1   : > { %v2781_v24 = vadd.f32 %v2780_v23, %v2661_v14  ;;  %v2782_v25 = vpop.f32.mrb[10].mxu0  ;;  %v3122_v49 = vsel %vm2359_vm1, %v3121_v19, 0.0  ;;  %v2566_v19 = vsel %vm2534_vm4, %v5314_v2, -inf }
 0x6b2   : > { %3123 = vadd.xlane.f32.xlu1 %v3122_v49  ;;  %4054 = vmatmul.mubr.f32.vlgmr.msra.gmra.mrb[6].mxu0 %v2932_v20  ;;  %v2783_v27 = vpop.f32.mrb[11].mxu0 }
 0x6b3   : > { %4057 = vmatpush3.xpose.msra.mxu1 %v2781_v24  ;;  %v3114_v28 = vmul.f32 %v2781_v24, %v2781_v24  ;;  %4063 = vmatprep.mubr.msk.f32.mxu0 %vm4794_vm0, %v4793_v38 }
 0x6b4   : > { %4066 = vmatprep.subr.mxu1 %v4793_v38 }
 0x6b5   : > { %v3115_v29 = vsel %vm2359_vm1, %v3114_v28, 0.0 }
 0x6b6   : > { %4059 = vmatmul.mubr.f32.vlgmr.msra.gmra.mrb[18].mxu1 %v2779_v13  ;;  %3116 = vadd.xlane.f32.xlu1 %v3115_v29 }
 0x6b7   : > { %4068 = vmatprep.mubr.msk.f32.mxu1 %vm4794_vm0, %v4793_v38  ;;  %v3359_v38 = vld [vmem:[#allocation8 + $0x10] sm:$0xf0] }
 0x6b8   : > { %v3363_v46 = vrot.slane %v3359_v38, 4 }
 0x6ba   : > { %2536 = vadd.xlane.f32.xlu1 %v2535_v30 }
 0x6cb   : > { %3200 = vperm.xlu1 %4371, %v2357_v31  }
 0x6cf   : > { %2445 = vperm.xlu1 %4371, %v2356_v32  }
 0x73f   : > { %v3124_v33 = vpop.xlane.xlu1 %3123 }
 0x740   : > { %v3125_v34 = vmax.f32 %v3124_v33, 1e-24 }
 0x742   : > { %4555 = vrsqrt.f32 %v3125_v34 }
 0x743   : > { %v3117_v35 = vpop.xlane.xlu1 %3116 }
 0x744   : > { %v3118_v36 = vmax.f32 %v3117_v35, 1e-24 }
 0x746   : > { %4557 = vrsqrt.f32 %v3118_v36 }
 0x747   : > { %v2537_v37 = vpop.xlane.xlu1 %2536 }
 0x748   : > { %4559 = vrcp.f32 %v2537_v37 }
 0x74b   : > { %v3201_v40 = vpop.permute.xlu1 %3200 }
 0x74c   : > { %v4556_v39 = vpop.eup %4555 }
 0x74d   : > { %v3127_v43 = vmul.f32 %v4556_v39, %v5320_v11 }
 0x74f   : > { %4062 = vmatpush3.xpose.msra.mxu0 %v3127_v43  ;;  %v2446_v54 = vpop.permute.xlu1 %2445 }
 0x750   : > { %v4558_v45 = vpop.eup %4557  ;;  %3367 = vmatprep.subr.mxu0 %v3364_v42  ;;  %v2448_v57 = vmul.f32 %v2446_v54, %v5316_v4 }
 0x751   : > { %v3120_v51 = vmul.f32 %v4558_v45, %v2781_v24 }
 0x752   : > { %v4560_v53 = vpop.eup %4559  ;;  %v2554_v59 = vsel %vm2534_vm4, %v2448_v57, -inf }
 0x753   : > { %4064 = vmatmul.mubr.f32.vlgmr.msra.gmra.mrb[12].mxu0 %v3120_v51  ;;  %4067 = vmatpush3.xpose.msra.mxu1 %v3120_v51  ;;  %v2539_v55 = vmul.f32 %v4560_v53, %v2533_v48 }
 0x754   : > { %3368 = vmatpush1.xpose.msra.mxu0 %v3363_v46  ;;  %3431 = vmatprep.mubr.f32.mxu0 %v2932_v20 }
 0x755   : > { %3443 = vmatprep.subr.mxu1 %v3440_v52  ;;  %v2540_v58 = vsel %vm2534_vm4, %v2539_v55, -inf }
 0x756   : > { %4069 = vmatmul.mubr.f32.vlgmr.msra.gmra.mrb[24].mxu1 %v3127_v43  ;;  %2541 = vmax.xlane.f32.xlu1 %v2540_v58 }
 0x757   : > { %3432 = vmatmul.mubr.f32.vlgmr.msra.gmra.mrb[14].mxu0 %v5320_v11  ;;  %3444 = vmatpush1.xpose.msra.mxu1 %v3439_v56 }
 0x758   : > { %3507 = vmatprep.mubr.f32.mxu1 %v2781_v24 }
 0x75a   : > { %3508 = vmatmul.mubr.f32.vlgmr.msra.gmra.mrb[26].mxu1 %v2779_v13  ;;  %2555 = vmax.xlane.f32.xlu1 %v2554_v59 }
 0x785   : > { %v3002_v60 = vpop.f32.mrb[6].mxu0 }
 0x786   : > { %v4055_v61 = vpop.f32.mrb[7].mxu0  ;;  %v3076_v37 = vmul.f32 %v3002_v60, %v3002_v60 }
 0x787   : > { %v4796_v61 = vmov 1  }
 0x788   : > { %v3077_v44 = vsel %vm2534_vm4, %v3076_v37, 0.0  ;;  %4372 = vset.pattern.permute.xlu1 %v4796_v61  ;;  %v4798_v37 = vmov 3  }
 0x789   : > { %v3072_v63 = vpop.f32.mrb[18].mxu1 }
 0x78a   : > { %v4060_v47 = vpop.f32.mrb[19].mxu1 }
 0x7e3   : > { %v2542_v0 = vpop.xlane.xlu1 %2541 }
 0x7e4   : > { %v2543_v1 = vsub.f32 %v2539_v55, %v2542_v0 }
 0x7e6   : > { %v2544_v4 = vmul.f32 1.442695, %v2543_v1 }
 0x7e7   : > { %v2556_v3 = vpop.xlane.xlu1 %2555 }
 0x7e8   : > { %v5342_v5 = vsub.f32 %v2448_v57, %v2556_v3  ;;  %4561 = vpow2.f32 %v2544_v4 }
 0x7ea   : > { %v2558_v6 = vmul.f32 1.442695, %v5342_v5 }
 0x7ec   : > { %4563 = vpow2.f32 %v2558_v6 }
 0x7f2   : > { %v4562_v20 = vpop.eup %4561 }
 0x7f3   : > { %v2546_v22 = vsel %vm2534_vm4, %v4562_v20, 0.0 }
 0x7f6   : > { %v4564_v23 = vpop.eup %4563 }
 0x7f7   : > { %v2560_v24 = vsel %vm2534_vm4, %v4564_v23, 0.0 }
 0x826   : > { %v3194_v7 = vpop.f32.mrb[12].mxu0 }
 0x827   : > { %v3203_v8 = vmul.f32 %v3201_v40, %v3194_v7  ;;  %v4065_v62 = vpop.f32.mrb[13].mxu0  ;;  %v3094_v40 = vmul.f32 %v3072_v63, %v3072_v63 }
 0x829   : > { %v3270_v9 = vpop.f32.mrb[24].mxu1  ;;  %v3274_v10 = vsel %vm2534_vm4, %v3203_v8, -inf  ;;  %v3095_v46 = vsel %vm2534_vm4, %v3094_v40, 0.0 }
 0x82a   : > { %v4070_v11 = vpop.f32.mrb[25].mxu1  ;;  %3275 = vmax.xlane.f32.xlu0 %v3274_v10  ;;  %v3433_v12 = vpop.f32.mrb[14].mxu0  ;;  %v3286_v14 = vsel %vm2534_vm4, %v3270_v9, -inf }
 0x82b   : > { %3287 = vmax.xlane.f32.xlu1 %v3286_v14  ;;  %v3435_v15 = vpop.f32.mrb[15].mxu0 }
 0x82d   : > { %v3509_v16 = vpop.f32.mrb[26].mxu1 }
 0x82e   : > { %v5347_v17 = vadd.f32 %v3509_v16, %v3433_v12  ;;  %v3511_v18 = vpop.f32.mrb[27].mxu1 }
 0x82f   : > { %2567 = vmax.xlane.f32.xlu1 %v2566_v19 }
 0x833   : > { %2547 = vadd.xlane.f32.xlu1 %v2546_v22 }
 0x837   : > { %2561 = vadd.xlane.f32.xlu1 %v2560_v24 }
 0x8b7   : > { %v3276_v25 = vpop.xlane.xlu0 %3275 }
 0x8b8   : > { %v3277_v49 = vsub.f32 %v3203_v8, %v3276_v25  ;;  %v3288_v26 = vpop.xlane.xlu1 %3287 }
 0x8b9   : > { %v5353_v27 = vsub.f32 %v3270_v9, %v3288_v26 }
 0x8ba   : > { %v3278_v28 = vmul.f32 1.442695, %v3277_v49 }
 0x8bb   : > { %v3290_v13 = vmul.f32 1.442695, %v5353_v27 }
 0x8bc   : > { %4565 = vpow2.f32 %v3278_v28  ;;  %v2568_v48 = vpop.xlane.xlu1 %2567 }
 0x8bd   : > { %v2569_v29 = vsub.f32 %v5314_v2, %v2568_v48  ;;  %4567 = vpow2.f32 %v3290_v13 }
 0x8bf   : > { %v2570_v30 = vmul.f32 1.442695, %v2569_v29 }
 0x8c0   : > { %v2548_v31 = vpop.xlane.xlu1 %2547 }
 0x8c1   : > { %4569 = vpow2.f32 %v2570_v30 }
 0x8c2   : > { %4571 = vlog2.f32 %v2548_v31 }
 0x8c4   : > { %v2562_v32 = vpop.xlane.xlu1 %2561 }
 0x8c5   : > { %4573 = vlog2.f32 %v2562_v32 }
 0x8c6   : > { %v4566_v33 = vpop.eup %4565 }
 0x8c7   : > { %v3280_v34 = vsel %vm2534_vm4, %v4566_v33, 0.0  ;;  %v4568_v35 = vpop.eup %4567 }
 0x8c8   : > { %3281 = vadd.xlane.f32.xlu0 %v3280_v34  ;;  %v3292_v21 = vsel %vm2534_vm4, %v4568_v35, 0.0  ;;  %v3513_v34 = vld [vmem:[#allocation8 + $0x13] ss:$0 sm:$0xff] }
 0x8c9   : > { %v3514_v35 = vadd.f32 %v3513_v34, %v5347_v17 }
 0x8cb   : > { %v4570_v36 = vpop.eup %4569 }
 0x8cc   : > { %v4572_v39 = vpop.eup %4571  ;;  %3293 = vadd.xlane.f32.xlu0 %v3292_v21  ;;  %v2572_v2 = vsel %vm2534_vm4, %v4570_v36, 0.0  ;;  %v4797_v36 = vmov 2  }
 0x8cd   : > { %v2550_v42 = vmul.f32 0.6931472, %v4572_v39  ;;  %2573 = vadd.xlane.f32.xlu1 %v2572_v2 }
 0x8cf   : > { %v4574_v43 = vpop.eup %4573  ;;  %v5360_v38 = vsub.f32 %v2543_v1, %v2550_v42 }
 0x8d0   : > { %v2564_v45 = vmul.f32 0.6931472, %v4574_v43  ;;  %3078 = vadd.xlane.f32.xlu0 %v3077_v44 }
 0x8d1   : > { %v2552_v50 = vmul.f32 1.442695, %v5360_v38  ;;  %3096 = vadd.xlane.f32.xlu1 %v3095_v46 }
 0x8d2   : > { %v2565_v51 = vsub.f32 %v5342_v5, %v2564_v45 }
 0x8d3   : > { %4575 = vpow2.f32 %v2552_v50 }
 0x8d4   : > { %v2590_v52 = vmul.f32 1.442695, %v2565_v51  ;;  %v2578_v53 = vsub.f32 %v5360_v38, %v2565_v51  ;;  %v2592_v56 = vsub.f32 %v2565_v51, %v5360_v38 }
 0x8d6   : > { %4577 = vpow2.f32 %v2590_v52 }
 0x8dd   : > { %v4576_v54 = vpop.eup %4575 }
 0x8de   : > { %v2579_v55 = vmul.f32 %v4576_v54, %v2578_v53 }
 0x8e0   : > { %v4578_v57 = vpop.eup %4577  ;;  %v2580_v58 = vsel %vm2534_vm4, %v2579_v55, 0.0 }
 0x8e1   : > { %2581 = vadd.xlane.f32.xlu0 %v2580_v58  ;;  %v2593_v59 = vmul.f32 %v4578_v57, %v2592_v56 }
 0x8e3   : > { %v2594_v60 = vsel %vm2534_vm4, %v2593_v59, 0.0 }
 0x8e4   : > { %2595 = vadd.xlane.f32.xlu1 %v2594_v60 }
 0x955   : > { %v3282_v63 = vpop.xlane.xlu0 %3281 }
 0x956   : > { %4579 = vlog2.f32 %v3282_v63 }
 0x959   : > { %v3294_v47 = vpop.xlane.xlu0 %3293 }
 0x95a   : > { %4581 = vlog2.f32 %v3294_v47  ;;  %v2574_v0 = vpop.xlane.xlu1 %2573 }
 0x95b   : > { %4583 = vlog2.f32 %v2574_v0 }
 0x95d   : > { %v3079_v21 = vpop.xlane.xlu0 %3078 }
 0x95e   : > { %v3097_v39 = vpop.xlane.xlu1 %3096  ;;  %v3080_v40 = vsel %vm2359_vm1, %v3079_v21, 0.0 }
 0x95f   : > { %v3098_v2 = vsel %vm2359_vm1, %v3097_v39, 0.0  ;;  %v3081_v42 = vrot.slane %v3080_v40, 4 }
 0x960   : > { %v4580_v1 = vpop.eup %4579  ;;  %v3099_v43 = vrot.slane %v3098_v2, 4 }
 0x961   : > { %v3284_v3 = vmul.f32 0.6931472, %v4580_v1 }
 0x962   : > { %v3100_v44 = vadd.f32 %v3099_v43, %v3098_v2 }
 0x963   : > { %v3285_v4 = vsub.f32 %v3277_v49, %v3284_v3 }
 0x964   : > { %v4582_v5 = vpop.eup %4581  ;;  %v3101_v17 = vrot.slane %v3100_v44, 2 }
 0x965   : > { %v4584_v6 = vpop.eup %4583  ;;  %v3296_v7 = vmul.f32 0.6931472, %v4582_v5  ;;  %v3298_v8 = vsub.f32 %v5360_v38, %v3285_v4  ;;  %v3310_v62 = vmul.f32 1.442695, %v3285_v4 }
 0x966   : > { %v2576_v9 = vmul.f32 0.6931472, %v4584_v6  ;;  %v3102_v51 = vadd.f32 %v3101_v17, %v3100_v44 }
 0x967   : > { %v3297_v10 = vsub.f32 %v5353_v27, %v3296_v7  ;;  %v3299_v11 = vmul.f32 %v4576_v54, %v3298_v8  ;;  %4585 = vpow2.f32 %v3310_v62 }
 0x968   : > { %v2577_v12 = vsub.f32 %v2569_v29, %v2576_v9  ;;  %v3312_v29 = vsub.f32 %v3285_v4, %v5360_v38  ;;  %v3103_v55 = vrot.slane %v3102_v51, 1 }
 0x969   : > { %v3336_v14 = vmul.f32 1.442695, %v3297_v10  ;;  %v3300_v15 = vsel %vm2534_vm4, %v3299_v11, 0.0  ;;  %v3324_v16 = vsub.f32 %v5360_v38, %v3297_v10  ;;  %v3338_v49 = vsub.f32 %v3297_v10, %v5360_v38 }
 0x96a   : > { %v2616_v18 = vmul.f32 1.442695, %v2577_v12  ;;  %3301 = vadd.xlane.f32.xlu0 %v3300_v15  ;;  %v2604_v19 = vsub.f32 %v5360_v38, %v2577_v12  ;;  %v2618_v27 = vsub.f32 %v2577_v12, %v5360_v38  ;;  %v3082_v38 = vadd.f32 %v3081_v42, %v3080_v40 }
 0x96b   : > { %4587 = vpow2.f32 %v3336_v14  ;;  %v3325_v20 = vmul.f32 %v4576_v54, %v3324_v16  ;;  %v5389_v59 = vadd.f32 %v3103_v55, %v3102_v51 }
 0x96c   : > { %4589 = vpow2.f32 %v2616_v18  ;;  %v2605_v22 = vmul.f32 %v4576_v54, %v2604_v19  ;;  %v3083_v45 = vrot.slane %v3082_v38, 2 }
 0x96d   : > { %v3326_v23 = vsel %vm2534_vm4, %v3325_v20, 0.0  ;;  %vm3107_vm6 = vcmp.eq.f32.partialorder %v5389_v59, inf  ;;  %vm3109_vm8 = vcmp.eq.f32.partialorder %v5389_v59, 0.0 }
 0x96e   : > { %3327 = vadd.xlane.f32.xlu0 %v3326_v23  ;;  %v2606_v24 = vsel %vm2534_vm4, %v2605_v22, 0.0  ;;  %v2582_v46 = vpop.xlane.xlu0 %2581  ;;  %v3084_v50 = vadd.f32 %v3083_v45, %v3082_v38 }
 0x96f   : > { %2607 = vadd.xlane.f32.xlu1 %v2606_v24  ;;  %v2583_v60 = vsel %vm2359_vm1, %v2582_v46, 0.0 }
 0x970   : > { %v3085_v54 = vrot.slane %v3084_v50, 1  ;;  %v2584_v1 = vrot.slane %v2583_v60, 4 }
 0x971   : > { %v4586_v25 = vpop.eup %4585  ;;  %v2596_v52 = vpop.xlane.xlu1 %2595 }
 0x972   : > { %v3313_v32 = vmul.f32 %v4586_v25, %v3312_v29  ;;  %v5386_v57 = vadd.f32 %v3085_v54, %v3084_v50  ;;  %v2597_v58 = vsel %vm2359_vm1, %v2596_v52, 0.0  ;;  %v2585_v8 = vadd.f32 %v2584_v1, %v2583_v60 }
 0x973   : > { %v2598_v0 = vrot.slane %v2597_v58, 4 }
 0x974   : > { %v3314_v33 = vsel %vm2534_vm4, %v3313_v32, 0.0  ;;  %4591 = vrsqrt.f32 %v5386_v57  ;;  %v2586_v20 = vrot.slane %v2585_v8, 2  ;;  %vm3089_vm5 = vcmp.eq.f32.partialorder %v5386_v57, inf }
 0x975   : > { %v4588_v26 = vpop.eup %4587  ;;  %4593 = vrsqrt.f32 %v5389_v59  ;;  %v2599_v6 = vadd.f32 %v2598_v0, %v2597_v58  ;;  %vm3091_vm7 = vcmp.eq.f32.partialorder %v5386_v57, 0.0  ;;  %v3092_v55 = vand.u32 2147483648, %v5386_v57 }
 0x976   : > { %v4590_v28 = vpop.eup %4589  ;;  %v3339_v13 = vmul.f32 %v4588_v26, %v3338_v49 }
 0x977   : > { %v2619_v48 = vmul.f32 %v4590_v28, %v2618_v27  ;;  %v2600_v16 = vrot.slane %v2599_v6, 2 }
 0x978   : > { %v3340_v30 = vsel %vm2534_vm4, %v3339_v13, 0.0 }
 0x979   : > { %3341 = vadd.xlane.f32.xlu0 %v3340_v30  ;;  %v2620_v31 = vsel %vm2534_vm4, %v2619_v48, 0.0  ;;  %v2601_v13 = vadd.f32 %v2600_v16, %v2599_v6 }
 0x97a   : > { %2621 = vadd.xlane.f32.xlu1 %v2620_v31  ;;  %v2587_v31 = vadd.f32 %v2586_v20, %v2585_v8 }
 0x97b   : > { %v2602_v21 = vrot.slane %v2601_v13, 1 }
 0x97c   : > { %v2588_v42 = vrot.slane %v2587_v31, 1 }
 0x97d   : > { %v2603_v50 = vadd.f32 %v2602_v21, %v2601_v13 }
 0x97e   : > { %3315 = vadd.xlane.f32.xlu1 %v3314_v33  ;;  %v4592_v26 = vpop.eup %4591  ;;  %v2589_v54 = vadd.f32 %v2588_v42, %v2587_v31 }
 0x97f   : > { %v4594_v28 = vpop.eup %4593 }
 0x980   : > { %v2630_v1 = vadd.f32 %v2603_v50, %v2589_v54 }
 0x98f   : > { %3528 = vperm.xlu1 %4372, %v3514_v35   ;;  %3522 = vperm.xlu0 %4370, %v3514_v35  }
 0x993   : > { %4373 = vset.pattern.permute.xlu1 %v4797_v36  ;;  %4374 = vset.pattern.permute.xlu0 %v4798_v37  ;;  %v3088_v36 = vmul.f32 %v4592_v26, %v5386_v57  ;;  %v3106_v37 = vmul.f32 %v4594_v28, %v5389_v59 }
 0x994   : > { %3534 = vperm.xlu1 %4373, %v3514_v35   ;;  %3540 = vperm.xlu0 %4374, %v3514_v35  }
 0x995   : > { %v3090_v17 = vsel %vm3089_vm5, %v5386_v57, %v3088_v36  ;;  %v3108_v46 = vsel %vm3107_vm6, %v5389_v59, %v3106_v37 }
 0x9f7   : > { %v3302_v53 = vpop.xlane.xlu0 %3301 }
 0x9f8   : > { %v3303_v63 = vsel %vm2359_vm1, %v3302_v53, 0.0 }
 0x9f9   : > { %v3304_v4 = vrot.slane %v3303_v63, 4 }
 0x9fb   : > { %v3328_v61 = vpop.xlane.xlu0 %3327  ;;  %v3305_v9 = vadd.f32 %v3304_v4, %v3303_v63 }
 0x9fc   : > { %v2608_v56 = vpop.xlane.xlu1 %2607  ;;  %v3329_v3 = vsel %vm2359_vm1, %v3328_v61, 0.0 }
 0x9fd   : > { %v2609_v47 = vsel %vm2359_vm1, %v2608_v56, 0.0  ;;  %v3330_v7 = vrot.slane %v3329_v3, 4  ;;  %v3306_v22 = vrot.slane %v3305_v9, 2  ;;  %v3110_v56 = vand.u32 2147483648, %v5389_v59 }
 0x9fe   : > { %v2610_v5 = vrot.slane %v2609_v47, 4  ;;  %v3516_v59 = vand.u32 127, %v534_v41 }
 0x9ff   : > { %v3331_v18 = vadd.f32 %v3330_v7, %v3329_v3  ;;  %v3307_v32 = vadd.f32 %v3306_v22, %v3305_v9  ;;  %v3111_v0 = vsel %vm3109_vm8, %v3110_v56, %v3108_v46 }
 0xa00   : > { %v2611_v10 = vadd.f32 %v2610_v5, %v2609_v47  ;;  %v3093_v47 = vsel %vm3091_vm7, %v3092_v55, %v3090_v17  ;;  %vm3517_vm9 = vcmp.eq.s32.totalorder %v3516_v59, 4  ;;  %vm3519_vm10 = vcmp.eq.s32.totalorder %v3516_v59, 0 }
 0xa01   : > { %v3332_v48 = vrot.slane %v3331_v18, 2  ;;  %v3308_v43 = vrot.slane %v3307_v32, 1  ;;  %vm3526_vm11 = vcmp.eq.s32.totalorder %v3516_v59, 1  ;;  %vm3532_vm12 = vcmp.eq.s32.totalorder %v3516_v59, 2 }
 0xa02   : > { %v2612_v23 = vrot.slane %v2611_v10, 2  ;;  %vm3538_vm13 = vcmp.eq.s32.totalorder %v3516_v59, 3 }
 0xa03   : > { %v3333_v39 = vadd.f32 %v3332_v48, %v3331_v18  ;;  %v3309_v58 = vadd.f32 %v3308_v43, %v3307_v32 }
 0xa04   : > { %v2613_v33 = vadd.f32 %v2612_v23, %v2611_v10 }
 0xa05   : > { %v3334_v51 = vrot.slane %v3333_v39, 1 }
 0xa06   : > { %v3342_v62 = vpop.xlane.xlu0 %3341  ;;  %v2614_v38 = vrot.slane %v2613_v33, 1 }
 0xa07   : > { %v3343_v11 = vsel %vm2359_vm1, %v3342_v62, 0.0  ;;  %v2622_v12 = vpop.xlane.xlu1 %2621  ;;  %v3335_v3 = vadd.f32 %v3334_v51, %v3333_v39  ;;  %v3112_v62 = vadd.f32 %v3111_v0, %v3093_v47 }
 0xa08   : > { %v3344_v14 = vrot.slane %v3343_v11, 4  ;;  %v2623_v15 = vsel %vm2359_vm1, %v2622_v12, 0.0  ;;  %v2615_v60 = vadd.f32 %v2614_v38, %v2613_v33 }
 0xa09   : > { %v2624_v19 = vrot.slane %v2623_v15, 4  ;;  %v3113_v10 = vmul.f32 0.5, %v3112_v62 }
 0xa0a   : > { %v3345_v24 = vadd.f32 %v3344_v14, %v3343_v11  ;;  %v2631_v6 = vadd.f32 %v2630_v1, %v2615_v60 }
 0xa0b   : > { %v2625_v25 = vadd.f32 %v2624_v19, %v2623_v15  ;;  %v3316_v49 = vpop.xlane.xlu1 %3315 }
 0xa0c   : > { %v3317_v27 = vsel %vm2359_vm1, %v3316_v49, 0.0  ;;  %v3346_v34 = vrot.slane %v3345_v24, 2 }
 0xa0d   : > { %v2626_v29 = vrot.slane %v2625_v25, 2  ;;  %v3318_v30 = vrot.slane %v3317_v27, 4 }
 0xa0e   : > { %v3347_v44 = vadd.f32 %v3346_v34, %v3345_v24  ;;  %v3523_v18 = vpop.permute.xlu0 %3522 }
 0xa0f   : > { %v3319_v35 = vadd.f32 %v3318_v30, %v3317_v27  ;;  %v2627_v40 = vadd.f32 %v2626_v29, %v2625_v25  ;;  %v3529_v16 = vpop.permute.xlu1 %3528 }
 0xa10   : > { %v3348_v61 = vrot.slane %v3347_v44, 1 }
 0xa11   : > { %v3320_v2 = vrot.slane %v3319_v35, 2  ;;  %v2628_v52 = vrot.slane %v2627_v40, 1 }
 0xa12   : > { %v3349_v7 = vadd.f32 %v3348_v61, %v3347_v44 }
 0xa13   : > { %v3321_v45 = vadd.f32 %v3320_v2, %v3319_v35  ;;  %v2629_v4 = vadd.f32 %v2628_v52, %v2627_v40  ;;  %v3535_v24 = vpop.permute.xlu1 %3534  ;;  %v3541_v49 = vpop.permute.xlu0 %3540 }
 0xa15   : > { %v3322_v53 = vrot.slane %v3321_v45, 1  ;;  %v2632_v9 = vadd.f32 %v2631_v6, %v2629_v4 }
 0xa17   : > { %v3323_v63 = vadd.f32 %v3322_v53, %v3321_v45  ;;  %v2633_v12 = vmul.f32 0.125, %v2632_v9 }
 0xa19   : > { %v3350_v5 = vadd.f32 %v3323_v63, %v3309_v58 }
 0xa1b   : > { %v3351_v8 = vadd.f32 %v3350_v5, %v3335_v3 }
 0xa1d   : > { %v3352_v57 = vadd.f32 %v3351_v8, %v3349_v7 }
 0xa1f   : > { %v3353_v11 = vmul.f32 0.125, %v3352_v57 }
 0xa21   : > { %v3354_v14 = vadd.f32 %v3353_v11, %v3113_v10 }
 0xa23   : > { %v3355_v15 = vadd.f32 %v3354_v14, %v2633_v12 }
 0xa25   : > { %v3356_v19 = vmul.f32 0.33333334, %v3355_v15 }
 0xa27   : > { %v3518_v20 = vsel %vm3517_vm9, %v3356_v19, 0.0 }
 0xa28   : > { %v3525_v22 = vsel %vm3519_vm10, %v3523_v18, %v3518_v20 }
 0xa29   : > { %v3531_v23 = vsel %vm3526_vm11, %v3529_v16, %v3525_v22 }
 0xa2a   : > { %v3537_v25 = vsel %vm3532_vm12, %v3535_v24, %v3531_v23 }
 0xa2b   : > { %v3543_v26 = vsel %vm3538_vm13, %v3541_v49, %v3537_v25 }
 0xa2c   : > { %3544 = vst [vmem:[%s5435_s8] sm:$0x3] %v3543_v26 }
 0xa2d PF: > { %p20_p13 = scmp.ge.s32.totalorder %s4987_s24, 6   ;;  %s5451_s27 = smov %s4771_s28 }
 0xa2e   : > { %s5452_s28 = smov %s4775_s29  ;;  %s5453_s29 = smov %s4998_s21 }
 0xa2f   : > { %s5454_s30 = smov %s4987_s24  ;;  %22 = sbr.rel (!%p20_p13) target bundleno = 5 (0x5), region = 118 }
 0xa36   :  { %3556 = vsyncpa [#allocation4], 1 }
 0xa37   :  { %3558 = vsyncpa [#allocation4 + $0x1], 1 }
 0xa38   :  { %3559 = vsyncpa [#allocation6], 1 }
 0xa39   :  { %3560 = vsyncpa [#allocation9], 1 }

</bundles_post_ra>
